<compile_context>
chip_gen: v7x
topology: tpu7x:2x2x1
jax: 0.10.0
libtpu: 0.0.40
codegen_flags: <defaults>
</compile_context>

<pallas_src>
from functools import partial

import numpy as np
import jax
import jax.numpy as jnp
from jax.experimental import pallas as pl
from jax.experimental.pallas import tpu as pltpu

EPS = 1e-5     # nn.InstanceNorm3d default (affine=False, biased variance)
NTAP = 27      # 3*3*3 taps
KPAD = 128     # im2col contraction dim padded to a full lane tile
GROW = 16      # rows per im2col store group == bf16 sublane-tile height


def _inorm(z, ones_s, inv_s):
    # z: [C, S] -- per-channel normalization over the spatial (lane) axis,
    # matching InstanceNorm3d (per (n, c) over D*H*W, biased variance).
    # Row sums go through the MXU (K=S dot with a ones vector) instead of a
    # cross-lane XLU reduce: the MXU is nearly idle at M=P while the XLUs are
    # busy with the im2col rolls (v6e/v7x only have 2).
    mu = jnp.dot(z, ones_s, preferred_element_type=jnp.float32) * inv_s   # [C,1]
    zc = z - mu
    var = jnp.dot(zc * zc, ones_s, preferred_element_type=jnp.float32) * inv_s
    return zc * jax.lax.rsqrt(var + EPS)


def bottleneck_kernel(x_ref, w1_ref, w2_ref, w3_ref, mask_ref, o_ref, col_ref,
                      *, spatial):
    # x_ref    : [1, Cin, S]    one batch element (grid axis 0), S = D*H*W
    # w1_ref   : [P, Cin]       conv1 (1x1x1), f32
    # w2_ref   : [P, KPAD]      conv2 (3x3x3) flattened to [P, 27*P]+pad, bf16
    # w3_ref   : [Cout, P]      conv3 (1x1x1), Cout == Cin (residual add)
    # mask_ref : [NG*16, S]     boundary masks replicated to the col row layout
    # o_ref    : [1, Cout, S]
    # col_ref  : [KPAD, S]      bf16 VMEM scratch: im2col buffer for conv2
    D, H, W = spatial
    S = D * H * W
    P = w1_ref.shape[0]
    G = GROW // P                     # taps per 16-row store group
    NG = mask_ref.shape[0] // GROW    # number of groups (ceil(NTAP / G))

    ones_s = jnp.ones((S, 1), jnp.float32)
    inv_s = 1.0 / S

    x = x_ref[0].astype(jnp.float32)                                  # [Cin, S]

    # ---- conv1 (1x1x1) -> IN -> ReLU ----
    h1 = jnp.dot(w1_ref[...], x, preferred_element_type=jnp.float32)  # [P, S]
    h1 = jnp.maximum(_inorm(h1, ones_s, inv_s), 0.0)

    # ---- conv2 (3x3x3, padding=1, stride=1) as ONE im2col matmul ----
    # col[k*P + c, s] = h1[c, s + off_k] (0 outside the volume) via a circular
    # lane roll plus a validity mask.  Taps are written in groups of G so every
    # store is a full, aligned (16,128) bf16 tile.
    for g in range(NG):
        taps = []
        for j in range(G):
            k = g * G + j
            if k >= NTAP:
                taps.append(h1)            # filler slot; its mask rows are 0
            else:
                kd, kh, kw = k // 9, (k // 3) % 3, k % 3
                off = (kd - 1) * (H * W) + (kh - 1) * W + (kw - 1)
                taps.append(h1 if off == 0
                            else pltpu.roll(h1, shift=(-off) % S, axis=1))
        rows = slice(GROW * g, GROW * (g + 1))
        group = jnp.concatenate(taps, axis=0) * mask_ref[rows, :]     # [16, S]
        col_ref[rows, :] = group.astype(jnp.bfloat16)

    # Keep the K-padding rows zero every step with ONE aligned 16-row store
    # (cheap; safe when the batch axis is sharded across TensorCores).  The
    # corresponding w2f pad columns are also zero.
    krows = NG * GROW
    if krows < KPAD:
        col_ref[krows:, :] = jnp.zeros((KPAD - krows, S), jnp.bfloat16)

    h2 = jnp.dot(w2_ref[...], col_ref[...],
                 preferred_element_type=jnp.float32)                   # [P, S]
    h2 = jnp.maximum(_inorm(h2, ones_s, inv_s), 0.0)

    # ---- conv3 (1x1x1) -> IN ----
    h3 = jnp.dot(w3_ref[...], h2, preferred_element_type=jnp.float32)  # [Cout,S]
    h3 = _inorm(h3, ones_s, inv_s)

    # ---- residual add + final ReLU (lane-dense store, S on lanes) ----
    o_ref[0] = jnp.maximum(h3 + x, 0.0).astype(o_ref.dtype)


def bottleneck_forward(x_ncdhw, w1, w2, w3):
    """x_ncdhw: [N, Cin, D, H, W]; w1:[P,Cin,1,1,1]; w2:[P,P,3,3,3]; w3:[4P,P,1,1,1]."""
    N, Cin, D, H, W = x_ncdhw.shape
    P = w1.shape[0]
    Cout = w3.shape[0]
    assert Cout == Cin, "downsample=None requires in_planes == planes * expansion"
    assert GROW % P == 0 and P <= GROW, "demo layout: 16-row groups need P | 16"
    S = D * H * W
    G = GROW // P                         # taps per store group
    NG = -(-NTAP // G)                    # number of groups
    KROWS = NG * GROW
    assert KROWS <= KPAD, "im2col K exceeds the padded tile; raise KPAD"

    # Free reshapes only (no transposes): channels-first, flattened spatial.
    x_flat = x_ncdhw.reshape(N, Cin, S)

    w1k = w1[:, :, 0, 0, 0]                                      # [P, Cin]
    w3k = w3[:, :, 0, 0, 0]                                      # [Cout, P]
    # conv2 weight -> [P, 27*P] with column index ((kd*3+kh)*3+kw)*P + c,
    # zero-padded to KPAD and cast to bf16 (MXU bf16 path, f32 accumulate).
    w2f = jnp.transpose(w2, (0, 2, 3, 4, 1)).reshape(P, NTAP * P)
    w2f = jnp.pad(w2f, ((0, 0), (0, KPAD - NTAP * P))).astype(jnp.bfloat16)

    # Per-tap validity masks, replicated P rows per tap so they line up with
    # the im2col row layout -> the kernel reads one aligned [16,S] tile per
    # store group (no strided single-row loads + sublane broadcasts).
    idx = np.arange(S)
    d_i = idx // (H * W)
    h_i = (idx // W) % H
    w_i = idx % W
    masks = np.zeros((KROWS, S), np.float32)
    for kd in range(3):
        for kh in range(3):
            for kw in range(3):
                k = (kd * 3 + kh) * 3 + kw
                ok = ((d_i + kd - 1 >= 0) & (d_i + kd - 1 < D) &
                      (h_i + kh - 1 >= 0) & (h_i + kh - 1 < H) &
                      (w_i + kw - 1 >= 0) & (w_i + kw - 1 < W))
                masks[k * P:(k + 1) * P, :] = ok.astype(np.float32)
    masks = jnp.asarray(masks)

    kernel = partial(bottleneck_kernel, spatial=(D, H, W))

    out = pl.pallas_call(
        kernel,
        out_shape=jax.ShapeDtypeStruct((N, Cout, S), x_ncdhw.dtype),
        grid_spec=pltpu.PrefetchScalarGridSpec(
            num_scalar_prefetch=0,
            grid=(N,),
            in_specs=[
                pl.BlockSpec((1, Cin, S), lambda n: (n, 0, 0)),
                pl.BlockSpec((P, Cin), lambda n: (0, 0)),
                pl.BlockSpec((P, KPAD), lambda n: (0, 0)),
                pl.BlockSpec((Cout, P), lambda n: (0, 0)),
                pl.BlockSpec((KROWS, S), lambda n: (0, 0)),
            ],
            out_specs=pl.BlockSpec((1, Cout, S), lambda n: (n, 0, 0)),
            scratch_shapes=[pltpu.VMEM((KPAD, S), jnp.bfloat16)],
        ),
        compiler_params=pltpu.CompilerParams(
            dimension_semantics=("parallel",)),   # batch is embarrassingly parallel
    )(x_flat, w1k, w2f, w3k, masks)

    return out.reshape(N, Cout, D, H, W)          # free reshape back to NCDHW


def reference_forward(x, w1, w2, w3):
    """Pure-JAX (XLA) reference mirroring the PyTorch forward, in NCDHW, all f32."""
    def conv(y, w, pad):
        return jax.lax.conv_general_dilated(
            y, w, window_strides=(1, 1, 1), padding=[(pad, pad)] * 3,
            dimension_numbers=("NCDHW", "OIDHW", "NCDHW"),
            precision=jax.lax.Precision.HIGHEST)

    def inorm(y):
        mu = y.mean(axis=(2, 3, 4), keepdims=True)
        var = ((y - mu) ** 2).mean(axis=(2, 3, 4), keepdims=True)
        return (y - mu) / jnp.sqrt(var + EPS)

    out = jax.nn.relu(inorm(conv(x, w1, 0)))
    out = jax.nn.relu(inorm(conv(out, w2, 1)))
    out = inorm(conv(out, w3, 0))
    return jax.nn.relu(out + x)


if __name__ == "__main__":
    key = jax.random.PRNGKey(0)
    N, planes, D, H, W = 2, 4, 8, 8, 8
    in_planes = planes * 4  # expansion = 4 -> residual add is shape-compatible

    k1, k2, k3, k4 = jax.random.split(key, 4)
    x = jax.random.normal(k1, (N, in_planes, D, H, W), jnp.float32)
    # Deterministic synthetic weights (same shapes as the PyTorch module's convs).
    w1 = 0.1 * jax.random.normal(k2, (planes, in_planes, 1, 1, 1), jnp.float32)
    w2 = 0.1 * jax.random.normal(k3, (planes, planes, 3, 3, 3), jnp.float32)
    w3 = 0.1 * jax.random.normal(k4, (planes * 4, planes, 1, 1, 1), jnp.float32)

    out = jax.block_until_ready(bottleneck_forward(x, w1, w2, w3))

    ref = reference_forward(x, w1, w2, w3)
    # Tolerance is set by the bf16 conv2 operand path (~2^-9 relative rounding
    # per operand, amplified through the two downstream InstanceNorms); the
    # rest of the pipeline is f32 with f32 accumulation.
    np.testing.assert_allclose(np.asarray(out), np.asarray(ref),
                               rtol=1e-2, atol=2e-2)
    print("KERNEL_OK")
</pallas_src>

<mosaic_0001>
module attributes {stable_mosaic.version = 11 : i64} {
  func.func @bottleneck_kernel(%arg0: i32, %arg1: memref<1x16x512xf32, #tpu.memory_space<vmem>>, %arg2: memref<4x16xf32, #tpu.memory_space<vmem>>, %arg3: memref<4x128xbf16, #tpu.memory_space<vmem>>, %arg4: memref<16x4xf32, #tpu.memory_space<vmem>>, %arg5: memref<112x512xf32, #tpu.memory_space<vmem>>, %arg6: memref<1x16x512xf32, #tpu.memory_space<vmem>>, %arg7: memref<128x512xbf16, #tpu.memory_space<vmem>>) attributes {dimension_semantics = [#tpu.dimension_semantics<parallel>], iteration_bounds = array<i64: 2>, scalar_prefetch = 0 : i64, scratch_operands = 1 : i64, tpu.core_type = #tpu.core_type<tc>, window_params = [{transform_indices = @transform_0, window_bounds = array<i64: 1, 16, 512>}, {pipeline_mode = #tpu.pipeline_mode<synchronous>, transform_indices = @transform_1, window_bounds = array<i64: 4, 16>}, {pipeline_mode = #tpu.pipeline_mode<synchronous>, transform_indices = @transform_2, window_bounds = array<i64: 4, 128>}, {pipeline_mode = #tpu.pipeline_mode<synchronous>, transform_indices = @transform_3, window_bounds = array<i64: 16, 4>}, {pipeline_mode = #tpu.pipeline_mode<synchronous>, transform_indices = @transform_4, window_bounds = array<i64: 112, 512>}, {transform_indices = @transform_5, window_bounds = array<i64: 1, 16, 512>}]} {
    %cst = arith.constant 1.000000e+00 : f32
    %0 = vector.broadcast %cst : f32 to vector<512x1xf32>
    %c0 = arith.constant 0 : index
    %c0_0 = arith.constant 0 : index
    %c0_1 = arith.constant 0 : index
    %1 = vector.load %arg1[%c0, %c0_0, %c0_1] : memref<1x16x512xf32, #tpu.memory_space<vmem>>, vector<1x16x512xf32>
    %2 = vector.shape_cast %1 : vector<1x16x512xf32> to vector<16x512xf32>
    %c0_2 = arith.constant 0 : index
    %c0_3 = arith.constant 0 : index
    %3 = vector.load %arg2[%c0_2, %c0_3] : memref<4x16xf32, #tpu.memory_space<vmem>>, vector<4x16xf32>
    %cst_4 = arith.constant dense<0.000000e+00> : vector<4x512xf32>
    %4 = tpu.matmul %3, %2, %cst_4 {dimension_numbers = #tpu.dot_dimension_numbers<[1], [0], [0], [1], [0, 0, 1, 1], [], []>} : vector<4x16xf32>, vector<16x512xf32>, vector<4x512xf32> -> vector<4x512xf32>
    %cst_5 = arith.constant dense<0.000000e+00> : vector<4x1xf32>
    %5 = tpu.matmul %4, %0, %cst_5 {dimension_numbers = #tpu.dot_dimension_numbers<[1], [0], [0], [1], [0, 0, 1, 1], [], []>} : vector<4x512xf32>, vector<512x1xf32>, vector<4x1xf32> -> vector<4x1xf32>
    %cst_6 = arith.constant 0.001953125 : f32
    %6 = vector.broadcast %cst_6 : f32 to vector<4x1xf32>
    %7 = arith.mulf %5, %6 : vector<4x1xf32>
    %8 = vector.broadcast %7 : vector<4x1xf32> to vector<4x512xf32>
    %9 = arith.subf %4, %8 : vector<4x512xf32>
    %10 = arith.mulf %9, %9 : vector<4x512xf32>
    %cst_7 = arith.constant dense<0.000000e+00> : vector<4x1xf32>
    %11 = tpu.matmul %10, %0, %cst_7 {dimension_numbers = #tpu.dot_dimension_numbers<[1], [0], [0], [1], [0, 0, 1, 1], [], []>} : vector<4x512xf32>, vector<512x1xf32>, vector<4x1xf32> -> vector<4x1xf32>
    %cst_8 = arith.constant 0.001953125 : f32
    %12 = vector.broadcast %cst_8 : f32 to vector<4x1xf32>
    %13 = arith.mulf %11, %12 : vector<4x1xf32>
    %cst_9 = arith.constant 9.99999974E-6 : f32
    %14 = vector.broadcast %cst_9 : f32 to vector<4x1xf32>
    %15 = arith.addf %13, %14 : vector<4x1xf32>
    %16 = math.rsqrt %15 : vector<4x1xf32>
    %17 = vector.broadcast %16 : vector<4x1xf32> to vector<4x512xf32>
    %18 = arith.mulf %9, %17 : vector<4x512xf32>
    %cst_10 = arith.constant 0.000000e+00 : f32
    %19 = vector.broadcast %cst_10 : f32 to vector<4x512xf32>
    %20 = arith.maximumf %18, %19 : vector<4x512xf32>
    %c73_i32 = arith.constant 73 : i32
    %21 = tpu.dynamic_rotate %20 by %c73_i32 dim 1 : vector<4x512xf32>, i32 -> vector<4x512xf32>
    %c72_i32 = arith.constant 72 : i32
    %22 = tpu.dynamic_rotate %20 by %c72_i32 dim 1 : vector<4x512xf32>, i32 -> vector<4x512xf32>
    %c71_i32 = arith.constant 71 : i32
    %23 = tpu.dynamic_rotate %20 by %c71_i32 dim 1 : vector<4x512xf32>, i32 -> vector<4x512xf32>
    %c65_i32 = arith.constant 65 : i32
    %24 = tpu.dynamic_rotate %20 by %c65_i32 dim 1 : vector<4x512xf32>, i32 -> vector<4x512xf32>
    %25 = tpu.concatenate %21, %22, %23, %24 in 0 : vector<4x512xf32>, vector<4x512xf32>, vector<4x512xf32>, vector<4x512xf32> -> vector<16x512xf32>
    %c0_11 = arith.constant 0 : index
    %c0_12 = arith.constant 0 : index
    %26 = vector.load %arg5[%c0_11, %c0_12] : memref<112x512xf32, #tpu.memory_space<vmem>>, vector<16x512xf32>
    %27 = arith.mulf %25, %26 : vector<16x512xf32>
    %28 = arith.truncf %27 : vector<16x512xf32> to vector<16x512xbf16>
    %c0_13 = arith.constant 0 : index
    %c0_14 = arith.constant 0 : index
    %29 = vector.load %arg7[%c0_13, %c0_14] : memref<128x512xbf16, #tpu.memory_space<vmem>>, vector<16x512xbf16>
    tpu.vector_store %arg7[%c0_13, %c0_14], %28 {strides = array<i32>} : memref<128x512xbf16, #tpu.memory_space<vmem>>, vector<16x512xbf16>,
    %c64_i32 = arith.constant 64 : i32
    %30 = tpu.dynamic_rotate %20 by %c64_i32 dim 1 : vector<4x512xf32>, i32 -> vector<4x512xf32>
    %c63_i32 = arith.constant 63 : i32
    %31 = tpu.dynamic_rotate %20 by %c63_i32 dim 1 : vector<4x512xf32>, i32 -> vector<4x512xf32>
    %c57_i32 = arith.constant 57 : i32
    %32 = tpu.dynamic_rotate %20 by %c57_i32 dim 1 : vector<4x512xf32>, i32 -> vector<4x512xf32>
    %c56_i32 = arith.constant 56 : i32
    %33 = tpu.dynamic_rotate %20 by %c56_i32 dim 1 : vector<4x512xf32>, i32 -> vector<4x512xf32>
    %34 = tpu.concatenate %30, %31, %32, %33 in 0 : vector<4x512xf32>, vector<4x512xf32>, vector<4x512xf32>, vector<4x512xf32> -> vector<16x512xf32>
    %c16 = arith.constant 16 : index
    %c0_15 = arith.constant 0 : index
    %35 = vector.load %arg5[%c16, %c0_15] : memref<112x512xf32, #tpu.memory_space<vmem>>, vector<16x512xf32>
    %36 = arith.mulf %34, %35 : vector<16x512xf32>
    %37 = arith.truncf %36 : vector<16x512xf32> to vector<16x512xbf16>
    %c16_16 = arith.constant 16 : index
    %c0_17 = arith.constant 0 : index
    %38 = vector.load %arg7[%c16_16, %c0_17] : memref<128x512xbf16, #tpu.memory_space<vmem>>, vector<16x512xbf16>
    tpu.vector_store %arg7[%c16_16, %c0_17], %37 {strides = array<i32>} : memref<128x512xbf16, #tpu.memory_space<vmem>>, vector<16x512xbf16>,
    %c55_i32 = arith.constant 55 : i32
    %39 = tpu.dynamic_rotate %20 by %c55_i32 dim 1 : vector<4x512xf32>, i32 -> vector<4x512xf32>
    %c9_i32 = arith.constant 9 : i32
    %40 = tpu.dynamic_rotate %20 by %c9_i32 dim 1 : vector<4x512xf32>, i32 -> vector<4x512xf32>
    %c8_i32 = arith.constant 8 : i32
    %41 = tpu.dynamic_rotate %20 by %c8_i32 dim 1 : vector<4x512xf32>, i32 -> vector<4x512xf32>
    %c7_i32 = arith.constant 7 : i32
    %42 = tpu.dynamic_rotate %20 by %c7_i32 dim 1 : vector<4x512xf32>, i32 -> vector<4x512xf32>
    %43 = tpu.concatenate %39, %40, %41, %42 in 0 : vector<4x512xf32>, vector<4x512xf32>, vector<4x512xf32>, vector<4x512xf32> -> vector<16x512xf32>
    %c32 = arith.constant 32 : index
    %c0_18 = arith.constant 0 : index
    %44 = vector.load %arg5[%c32, %c0_18] : memref<112x512xf32, #tpu.memory_space<vmem>>, vector<16x512xf32>
    %45 = arith.mulf %43, %44 : vector<16x512xf32>
    %46 = arith.truncf %45 : vector<16x512xf32> to vector<16x512xbf16>
    %c32_19 = arith.constant 32 : index
    %c0_20 = arith.constant 0 : index
    %47 = vector.load %arg7[%c32_19, %c0_20] : memref<128x512xbf16, #tpu.memory_space<vmem>>, vector<16x512xbf16>
    tpu.vector_store %arg7[%c32_19, %c0_20], %46 {strides = array<i32>} : memref<128x512xbf16, #tpu.memory_space<vmem>>, vector<16x512xbf16>,
    %c1_i32 = arith.constant 1 : i32
    %48 = tpu.dynamic_rotate %20 by %c1_i32 dim 1 : vector<4x512xf32>, i32 -> vector<4x512xf32>
    %c511_i32 = arith.constant 511 : i32
    %49 = tpu.dynamic_rotate %20 by %c511_i32 dim 1 : vector<4x512xf32>, i32 -> vector<4x512xf32>
    %c505_i32 = arith.constant 505 : i32
    %50 = tpu.dynamic_rotate %20 by %c505_i32 dim 1 : vector<4x512xf32>, i32 -> vector<4x512xf32>
    %51 = tpu.concatenate %48, %20, %49, %50 in 0 : vector<4x512xf32>, vector<4x512xf32>, vector<4x512xf32>, vector<4x512xf32> -> vector<16x512xf32>
    %c48 = arith.constant 48 : index
    %c0_21 = arith.constant 0 : index
    %52 = vector.load %arg5[%c48, %c0_21] : memref<112x512xf32, #tpu.memory_space<vmem>>, vector<16x512xf32>
    %53 = arith.mulf %51, %52 : vector<16x512xf32>
    %54 = arith.truncf %53 : vector<16x512xf32> to vector<16x512xbf16>
    %c48_22 = arith.constant 48 : index
    %c0_23 = arith.constant 0 : index
    %55 = vector.load %arg7[%c48_22, %c0_23] : memref<128x512xbf16, #tpu.memory_space<vmem>>, vector<16x512xbf16>
    tpu.vector_store %arg7[%c48_22, %c0_23], %54 {strides = array<i32>} : memref<128x512xbf16, #tpu.memory_space<vmem>>, vector<16x512xbf16>,
    %c504_i32 = arith.constant 504 : i32
    %56 = tpu.dynamic_rotate %20 by %c504_i32 dim 1 : vector<4x512xf32>, i32 -> vector<4x512xf32>
    %c503_i32 = arith.constant 503 : i32
    %57 = tpu.dynamic_rotate %20 by %c503_i32 dim 1 : vector<4x512xf32>, i32 -> vector<4x512xf32>
    %c457_i32 = arith.constant 457 : i32
    %58 = tpu.dynamic_rotate %20 by %c457_i32 dim 1 : vector<4x512xf32>, i32 -> vector<4x512xf32>
    %c456_i32 = arith.constant 456 : i32
    %59 = tpu.dynamic_rotate %20 by %c456_i32 dim 1 : vector<4x512xf32>, i32 -> vector<4x512xf32>
    %60 = tpu.concatenate %56, %57, %58, %59 in 0 : vector<4x512xf32>, vector<4x512xf32>, vector<4x512xf32>, vector<4x512xf32> -> vector<16x512xf32>
    %c64 = arith.constant 64 : index
    %c0_24 = arith.constant 0 : index
    %61 = vector.load %arg5[%c64, %c0_24] : memref<112x512xf32, #tpu.memory_space<vmem>>, vector<16x512xf32>
    %62 = arith.mulf %60, %61 : vector<16x512xf32>
    %63 = arith.truncf %62 : vector<16x512xf32> to vector<16x512xbf16>
    %c64_25 = arith.constant 64 : index
    %c0_26 = arith.constant 0 : index
    %64 = vector.load %arg7[%c64_25, %c0_26] : memref<128x512xbf16, #tpu.memory_space<vmem>>, vector<16x512xbf16>
    tpu.vector_store %arg7[%c64_25, %c0_26], %63 {strides = array<i32>} : memref<128x512xbf16, #tpu.memory_space<vmem>>, vector<16x512xbf16>,
    %c455_i32 = arith.constant 455 : i32
    %65 = tpu.dynamic_rotate %20 by %c455_i32 dim 1 : vector<4x512xf32>, i32 -> vector<4x512xf32>
    %c449_i32 = arith.constant 449 : i32
    %66 = tpu.dynamic_rotate %20 by %c449_i32 dim 1 : vector<4x512xf32>, i32 -> vector<4x512xf32>
    %c448_i32 = arith.constant 448 : i32
    %67 = tpu.dynamic_rotate %20 by %c448_i32 dim 1 : vector<4x512xf32>, i32 -> vector<4x512xf32>
    %c447_i32 = arith.constant 447 : i32
    %68 = tpu.dynamic_rotate %20 by %c447_i32 dim 1 : vector<4x512xf32>, i32 -> vector<4x512xf32>
    %69 = tpu.concatenate %65, %66, %67, %68 in 0 : vector<4x512xf32>, vector<4x512xf32>, vector<4x512xf32>, vector<4x512xf32> -> vector<16x512xf32>
    %c80 = arith.constant 80 : index
    %c0_27 = arith.constant 0 : index
    %70 = vector.load %arg5[%c80, %c0_27] : memref<112x512xf32, #tpu.memory_space<vmem>>, vector<16x512xf32>
    %71 = arith.mulf %69, %70 : vector<16x512xf32>
    %72 = arith.truncf %71 : vector<16x512xf32> to vector<16x512xbf16>
    %c80_28 = arith.constant 80 : index
    %c0_29 = arith.constant 0 : index
    %73 = vector.load %arg7[%c80_28, %c0_29] : memref<128x512xbf16, #tpu.memory_space<vmem>>, vector<16x512xbf16>
    tpu.vector_store %arg7[%c80_28, %c0_29], %72 {strides = array<i32>} : memref<128x512xbf16, #tpu.memory_space<vmem>>, vector<16x512xbf16>,
    %c441_i32 = arith.constant 441 : i32
    %74 = tpu.dynamic_rotate %20 by %c441_i32 dim 1 : vector<4x512xf32>, i32 -> vector<4x512xf32>
    %c440_i32 = arith.constant 440 : i32
    %75 = tpu.dynamic_rotate %20 by %c440_i32 dim 1 : vector<4x512xf32>, i32 -> vector<4x512xf32>
    %c439_i32 = arith.constant 439 : i32
    %76 = tpu.dynamic_rotate %20 by %c439_i32 dim 1 : vector<4x512xf32>, i32 -> vector<4x512xf32>
    %77 = tpu.concatenate %74, %75, %76, %20 in 0 : vector<4x512xf32>, vector<4x512xf32>, vector<4x512xf32>, vector<4x512xf32> -> vector<16x512xf32>
    %c96 = arith.constant 96 : index
    %c0_30 = arith.constant 0 : index
    %78 = vector.load %arg5[%c96, %c0_30] : memref<112x512xf32, #tpu.memory_space<vmem>>, vector<16x512xf32>
    %79 = arith.mulf %77, %78 : vector<16x512xf32>
    %80 = arith.truncf %79 : vector<16x512xf32> to vector<16x512xbf16>
    %c96_31 = arith.constant 96 : index
    %c0_32 = arith.constant 0 : index
    %81 = vector.load %arg7[%c96_31, %c0_32] : memref<128x512xbf16, #tpu.memory_space<vmem>>, vector<16x512xbf16>
    tpu.vector_store %arg7[%c96_31, %c0_32], %80 {strides = array<i32>} : memref<128x512xbf16, #tpu.memory_space<vmem>>, vector<16x512xbf16>,
    %cst_33 = arith.constant 0.000000e+00 : bf16
    %82 = vector.broadcast %cst_33 : bf16 to vector<16x512xbf16>
    %c112 = arith.constant 112 : index
    %c0_34 = arith.constant 0 : index
    %83 = vector.load %arg7[%c112, %c0_34] : memref<128x512xbf16, #tpu.memory_space<vmem>>, vector<16x512xbf16>
    tpu.vector_store %arg7[%c112, %c0_34], %82 {strides = array<i32>} : memref<128x512xbf16, #tpu.memory_space<vmem>>, vector<16x512xbf16>,
    %c0_35 = arith.constant 0 : index
    %c0_36 = arith.constant 0 : index
    %84 = vector.load %arg3[%c0_35, %c0_36] : memref<4x128xbf16, #tpu.memory_space<vmem>>, vector<4x128xbf16>
    %c0_37 = arith.constant 0 : index
    %c0_38 = arith.constant 0 : index
    %85 = vector.load %arg7[%c0_37, %c0_38] : memref<128x512xbf16, #tpu.memory_space<vmem>>, vector<128x512xbf16>
    %cst_39 = arith.constant dense<0.000000e+00> : vector<4x512xf32>
    %86 = tpu.matmul %84, %85, %cst_39 {dimension_numbers = #tpu.dot_dimension_numbers<[1], [0], [0], [1], [0, 0, 1, 1], [], []>} : vector<4x128xbf16>, vector<128x512xbf16>, vector<4x512xf32> -> vector<4x512xf32>
    %cst_40 = arith.constant dense<0.000000e+00> : vector<4x1xf32>
    %87 = tpu.matmul %86, %0, %cst_40 {dimension_numbers = #tpu.dot_dimension_numbers<[1], [0], [0], [1], [0, 0, 1, 1], [], []>} : vector<4x512xf32>, vector<512x1xf32>, vector<4x1xf32> -> vector<4x1xf32>
    %cst_41 = arith.constant 0.001953125 : f32
    %88 = vector.broadcast %cst_41 : f32 to vector<4x1xf32>
    %89 = arith.mulf %87, %88 : vector<4x1xf32>
    %90 = vector.broadcast %89 : vector<4x1xf32> to vector<4x512xf32>
    %91 = arith.subf %86, %90 : vector<4x512xf32>
    %92 = arith.mulf %91, %91 : vector<4x512xf32>
    %cst_42 = arith.constant dense<0.000000e+00> : vector<4x1xf32>
    %93 = tpu.matmul %92, %0, %cst_42 {dimension_numbers = #tpu.dot_dimension_numbers<[1], [0], [0], [1], [0, 0, 1, 1], [], []>} : vector<4x512xf32>, vector<512x1xf32>, vector<4x1xf32> -> vector<4x1xf32>
    %cst_43 = arith.constant 0.001953125 : f32
    %94 = vector.broadcast %cst_43 : f32 to vector<4x1xf32>
    %95 = arith.mulf %93, %94 : vector<4x1xf32>
    %cst_44 = arith.constant 9.99999974E-6 : f32
    %96 = vector.broadcast %cst_44 : f32 to vector<4x1xf32>
    %97 = arith.addf %95, %96 : vector<4x1xf32>
    %98 = math.rsqrt %97 : vector<4x1xf32>
    %99 = vector.broadcast %98 : vector<4x1xf32> to vector<4x512xf32>
    %100 = arith.mulf %91, %99 : vector<4x512xf32>
    %cst_45 = arith.constant 0.000000e+00 : f32
    %101 = vector.broadcast %cst_45 : f32 to vector<4x512xf32>
    %102 = arith.maximumf %100, %101 : vector<4x512xf32>
    %c0_46 = arith.constant 0 : index
    %c0_47 = arith.constant 0 : index
    %103 = vector.load %arg4[%c0_46, %c0_47] : memref<16x4xf32, #tpu.memory_space<vmem>>, vector<16x4xf32>
    %cst_48 = arith.constant dense<0.000000e+00> : vector<16x512xf32>
    %104 = tpu.matmul %103, %102, %cst_48 {dimension_numbers = #tpu.dot_dimension_numbers<[1], [0], [0], [1], [0, 0, 1, 1], [], []>} : vector<16x4xf32>, vector<4x512xf32>, vector<16x512xf32> -> vector<16x512xf32>
    %cst_49 = arith.constant dense<0.000000e+00> : vector<16x1xf32>
    %105 = tpu.matmul %104, %0, %cst_49 {dimension_numbers = #tpu.dot_dimension_numbers<[1], [0], [0], [1], [0, 0, 1, 1], [], []>} : vector<16x512xf32>, vector<512x1xf32>, vector<16x1xf32> -> vector<16x1xf32>
    %cst_50 = arith.constant 0.001953125 : f32
    %106 = vector.broadcast %cst_50 : f32 to vector<16x1xf32>
    %107 = arith.mulf %105, %106 : vector<16x1xf32>
    %108 = vector.broadcast %107 : vector<16x1xf32> to vector<16x512xf32>
    %109 = arith.subf %104, %108 : vector<16x512xf32>
    %110 = arith.mulf %109, %109 : vector<16x512xf32>
    %cst_51 = arith.constant dense<0.000000e+00> : vector<16x1xf32>
    %111 = tpu.matmul %110, %0, %cst_51 {dimension_numbers = #tpu.dot_dimension_numbers<[1], [0], [0], [1], [0, 0, 1, 1], [], []>} : vector<16x512xf32>, vector<512x1xf32>, vector<16x1xf32> -> vector<16x1xf32>
    %cst_52 = arith.constant 0.001953125 : f32
    %112 = vector.broadcast %cst_52 : f32 to vector<16x1xf32>
    %113 = arith.mulf %111, %112 : vector<16x1xf32>
    %cst_53 = arith.constant 9.99999974E-6 : f32
    %114 = vector.broadcast %cst_53 : f32 to vector<16x1xf32>
    %115 = arith.addf %113, %114 : vector<16x1xf32>
    %116 = math.rsqrt %115 : vector<16x1xf32>
    %117 = vector.broadcast %116 : vector<16x1xf32> to vector<16x512xf32>
    %118 = arith.mulf %109, %117 : vector<16x512xf32>
    %119 = arith.addf %118, %2 : vector<16x512xf32>
    %cst_54 = arith.constant 0.000000e+00 : f32
    %120 = vector.broadcast %cst_54 : f32 to vector<16x512xf32>
    %121 = arith.maximumf %119, %120 : vector<16x512xf32>
    %c0_55 = arith.constant 0 : index
    %c0_56 = arith.constant 0 : index
    %c0_57 = arith.constant 0 : index
    %122 = vector.load %arg6[%c0_55, %c0_56, %c0_57] : memref<1x16x512xf32, #tpu.memory_space<vmem>>, vector<1x16x512xf32>
    %123 = vector.shape_cast %122 : vector<1x16x512xf32> to vector<16x512xf32>
    %124 = vector.shape_cast %121 : vector<16x512xf32> to vector<1x16x512xf32>
    tpu.vector_store %arg6[%c0_55, %c0_56, %c0_57], %124 {strides = array<i32>} : memref<1x16x512xf32, #tpu.memory_space<vmem>>, vector<1x16x512xf32>,
    return
  }
  func.func @transform_0(%arg0: i32) -> (i32, i32, i32) {
    %c0_i32 = arith.constant 0 : i32
    %c0_i32_0 = arith.constant 0 : i32
    %c0_i32_1 = arith.constant 0 : i32
    return %arg0, %c0_i32, %c0_i32_0 : i32, i32, i32
  }
  func.func @transform_1(%arg0: i32) -> (i32, i32) {
    %c0_i32 = arith.constant 0 : i32
    %c0_i32_0 = arith.constant 0 : i32
    %c0_i32_1 = arith.constant 0 : i32
    return %c0_i32, %c0_i32_0 : i32, i32
  }
  func.func @transform_2(%arg0: i32) -> (i32, i32) {
    %c0_i32 = arith.constant 0 : i32
    %c0_i32_0 = arith.constant 0 : i32
    %c0_i32_1 = arith.constant 0 : i32
    return %c0_i32, %c0_i32_0 : i32, i32
  }
  func.func @transform_3(%arg0: i32) -> (i32, i32) {
    %c0_i32 = arith.constant 0 : i32
    %c0_i32_0 = arith.constant 0 : i32
    %c0_i32_1 = arith.constant 0 : i32
    return %c0_i32, %c0_i32_0 : i32, i32
  }
  func.func @transform_4(%arg0: i32) -> (i32, i32) {
    %c0_i32 = arith.constant 0 : i32
    %c0_i32_0 = arith.constant 0 : i32
    %c0_i32_1 = arith.constant 0 : i32
    return %c0_i32, %c0_i32_0 : i32, i32
  }
  func.func @transform_5(%arg0: i32) -> (i32, i32, i32) {
    %c0_i32 = arith.constant 0 : i32
    %c0_i32_0 = arith.constant 0 : i32
    %c0_i32_1 = arith.constant 0 : i32
    return %arg0, %c0_i32, %c0_i32_0 : i32, i32, i32
  }
}

</mosaic_0001>

<bundles_post_ra>
// kernel: tpu_custom_call.1
= control target key start
LH: loop header
LB: loop body
LE: loop exit
PB: predicated region body
PF: predicated region fallthrough
CT: control target
= control target key end

     0   :  { %10 = vsyncpa [#allocation4], 0  ;;  %s4149_s0 = inlined_call_operand.hbm [shape: f32[2,16,512], index: 0, kind: input, shape index: {}]   ;;  %s4150_s1 = inlined_call_operand.vmem [shape: f32[4,16], index: 1, kind: input, shape index: {}]   ;;  %s4151_s2 = inlined_call_operand.vmem [shape: bf16[4,128], index: 2, kind: input, shape index: {}]   ;;  %s4152_s3 = inlined_call_operand.vmem [shape: f32[16,4], index: 3, kind: input, shape index: {}]   ;;  %s4153_s4 = inlined_call_operand.hbm [shape: f32[112,512], index: 4, kind: input, shape index: {}]   ;;  %s4154_s5 = inlined_call_operand.hbm [shape: f32[2,16,512], index: 5, kind: output, shape index: {}]  }
   0x1   :  { %12 = vsyncpa [#allocation4 + $0x1], 0 }
   0x2   :  { %13 = vsyncpa [#allocation7], 0 }
   0x3   :  { %14 = vsyncpa [#allocation5], 0 }
   0x4   :  { %16 = vsyncpa [#allocation5 + $0x1], 0  ;;  %s3287_s18 = smov 0   ;;  %s3289_s19 = smov 0  }
   0x5   :  { %s3291_s20 = smov 0   ;;  %s3293_s21 = smov 0  }
   0x6 LB: > { %s3308_s22 = sadd.s32 4294967295, %s3228_s21   ;;  %s2341_s23 = sadd.s32 4294967294, %s3228_s21   ;;  %s3228_s21 = sphi %s3293_s21, %s4177_s21   ;;  %s3224_s20 = sphi %s3291_s20, %s4176_s20   ;;  %s3220_s19 = sphi %s3289_s19, %s4175_s19   ;;  %s3216_s18 = sphi %s3287_s18, %s4174_s18  }
   0x7   : > { %p42_p0 = scmp.ne.s32.totalorder %s3220_s19, %s3216_s18  ;;  %p4155_p1 = scmp.eq.s32.totalorder %s3308_s22, 0 }
   0x8   : > { %p156_p3 = scmp.eq.s32.totalorder %s2341_s23, 1  ;;  %p2342_p5 = scmp.ge.s32.totalorder %s3228_s21, 1 }
   0x9   : > { %p3317_p4 = por %p4155_p1, %p42_p0  ;;  %p163_p7 = scmp.lt.s32.totalorder %s3228_s21, 3 }
   0xa   : > { %p3322_p6 = por %p156_p3, %p42_p0  ;;  %s3230_s27 = smov [#allocation6]  }
   0xb   : > { %s4160_s24 = scalar_select %p3317_p4, 1, 0 }
   0xc   : > { %s4161_s25 = scalar_select %p3322_p6, 1, 0 }
   0xd   : > { %p3327_p8 = pnand %p2342_p5, %p163_p7  ;;  %s184_s28 = sshll.u32 %s3230_s27, 4  ;;  %s3331_s28 = int_to_ptr.vmem [resolvable:$true] %s184_s28 }
   0xe   : > { %s3343_s30 = sadd.s32 1, %s3228_s21   ;;  %s29_s6 = sadd.s32 1, %s3224_s20 }
   0xf   : > { %s4162_s26 = scalar_select %p3327_p8, 1, 0 }
  0x10   : > { %p3009_p9 = pneg %p3327_p8  ;;  %s26_s7 = ssub.s32 %s3228_s21, %s3343_s30 }
  0x11   : > { %s3100_s10 = scalar_lea.hbm %s4153_s4, 7168 }
  0x12   : > { %p3338_p11 = pnand %p3009_p9, %p4155_p1  ;;  %p3101_p12 = scmp.ne.s32.totalorder %s4153_s4, %s3100_s10 }
  0x13   : > { %p3107_p5 = scmp.lt.u32.totalorder %s3100_s10, %s4153_s4 }
  0x14   : > { %p3102_p13 = pneg %p3338_p11 }
  0x16   : > { %p3103_p0 = pnand %p3102_p13, %p3101_p12 }
  0x18   : > { %p3104_p3 = pneg %p3103_p0 }
  0x1a   : > { %p3109_p7 = pnand %p3107_p5, %p3104_p3 }
  0x1c   : > { %3112 = shalt.err (!%p3109_p7)
}
  0x1d   : > { %s3113_s15 = scalar_lea.vmem %s3331_s28, 7168  ;;  %p3121_p2 = scmp.lt.s32.totalorder %s3331_s28, %s3331_s28 }
  0x1e   : > { %p3114_p9 = scmp.ne.s32.totalorder %s3331_s28, %s3113_s15  ;;  %p3122_p6 = scmp.lt.s32.totalorder %s3113_s15, %s3113_s15 }
  0x20   : > { %p3116_p10 = pnand %p3114_p9, %p3102_p13  ;;  %p3123_p4 = por %p3122_p6, %p3121_p2 }
  0x22   : > { %p3117_p1 = pneg %p3116_p10 }
  0x24   : > { %p3124_p8 = pnand %p3123_p4, %p3117_p1 }
  0x26   : > { %3127 = shalt.err (!%p3124_p8)
}
  0x27   : > { %s3231_s16 = smov 512   ;;  %s3232_s17 = smov 32  }
  0x28   : > { %3012 = dma.hbm_to_vmem [thread:$0]  (!%p3338_p11), %s4153_s4, 7168, %s3331_s28, [#allocation7], %s3231_s16, %s3231_s16, %s3232_s17  }
  0x29   : > { %p27_p1 = scmp.eq.s32.totalorder %s26_s7, 0  ;;  %p36_p2 = scmp.ne.s32.totalorder %s3224_s20, %s3220_s19 }
  0x2a   : > { %p37_p4 = scmp.eq.s32.totalorder %s3228_s21, 0  ;;  %p3022_p6 = scmp.lt.s32.totalorder %s3228_s21, 2 }
  0x2b   : > { %s3377_s8 = scalar_select %p27_p1, %s3224_s20, %s29_s6  }
  0x2c   : > { %p38_p8 = por %p37_p4, %p36_p2  ;;  %p4164_p10 = scmp.eq.s32.totalorder %s3308_s22, 1 }
  0x2d   : > { %s198_s29 = sand.u32 1, %s3224_s20   ;;  %s2367_s10 = sshll.u32 %s3228_s21, 10 }
  0x2e   : > { %p3381_p12 = por %p4164_p10, %p36_p2  ;;  %s2345_s11 = sshll.u32 %s198_s29, 6 }
  0x2f   : > { %s3390_s14 = scalar_lea.hbm %s4149_s0, %s2367_s10  ;;  %s202_s28 = scalar_lea.vmem [#allocation3], %s2345_s11 }
  0x30   : > { %s209_s6 = sshll.u32 %s202_s28, 4  ;;  %p3392_p11 = pnand %p3022_p6, %p38_p8  ;;  %s3396_s6 = int_to_ptr.vmem [resolvable:$true] %s209_s6 }
  0x31   : > { %s3398_s15 = scalar_lea.sflag [#allocation4], %s198_s29  ;;  %s3128_s23 = scalar_lea.hbm %s3390_s14, 1024 }
  0x32   : > { %p3129_p13 = scmp.ne.s32.totalorder %s3390_s14, %s3128_s23  ;;  %p3130_p0 = pneg %p3392_p11 }
  0x33   : > { %s3133_s11 = scalar_lea.hbm %s4149_s0, 2048  ;;  %p3134_p7 = scmp.lt.u32.totalorder %s3390_s14, %s4149_s0 }
  0x34   : > { %p3131_p3 = pnand %p3130_p0, %p3129_p13  ;;  %p3135_p9 = scmp.lt.u32.totalorder %s3133_s11, %s3128_s23 }
  0x35   : > { %p3137_p2 = scmp.lt.u32.totalorder %s3128_s23, %s3390_s14 }
  0x36   : > { %p3132_p5 = pneg %p3131_p3  ;;  %p3136_p1 = por %p3135_p9, %p3134_p7 }
  0x38   : > { %p3138_p4 = por %p3137_p2, %p3136_p1 }
  0x3a   : > { %p3139_p6 = pnand %p3138_p4, %p3132_p5 }
  0x3c   : > { %3142 = shalt.err (!%p3139_p6)
}
  0x3d   : > { %s3143_s29 = scalar_lea.vmem %s3396_s6, 1024  ;;  %s3233_s28 = smov [#allocation3]  }
  0x3e   : > { %p3144_p8 = scmp.ne.s32.totalorder %s3396_s6, %s3143_s29  ;;  %s3148_s27 = sshll.u32 %s3233_s28, 4  ;;  %s3149_s27 = int_to_ptr.vmem [resolvable:$false] %s3148_s27 }
  0x3f   : > { %s3150_s10 = scalar_lea.vmem %s3149_s27, 2048  ;;  %p3151_p3 = scmp.lt.s32.totalorder %s3396_s6, %s3149_s27 }
  0x40   : > { %p3146_p10 = pnand %p3144_p8, %p3130_p0  ;;  %p3152_p7 = scmp.lt.s32.totalorder %s3150_s10, %s3143_s29 }
  0x42   : > { %p3147_p13 = pneg %p3146_p10  ;;  %p3153_p9 = por %p3152_p7, %p3151_p3 }
  0x44   : > { %p3154_p1 = pnand %p3153_p9, %p3147_p13 }
  0x46   : > { %3157 = shalt.err (!%p3154_p1)
}
  0x47   : > { %3016 = dma.hbm_to_vmem [thread:$0]  (!%p3392_p11), %s3390_s14, 1024, %s3396_s6, %s3398_s15, %s3231_s16, %s3231_s16, %s3232_s17  }
  0x48   : > { %p4167_p0 = scmp.ne.s32.totalorder %s4162_s26, 0 }
  0x49   : > { %s3432_s23 = sand.u32 (!%p4167_p0), 1, %s3220_s19   ;;  %p4168_p5 = scmp.ne.s32.totalorder (!%p4167_p0), %s4160_s24, 0 }
  0x4a   : > { %221 = sbr.rel (%p4167_p0) target bundleno = 3179 (0xc6b), region = 40  ;;  %s2349_s11 = sshll.u32 (!%p4167_p0), %s3432_s23, 6 }
  0x4b   : > { %s224_s12 = scalar_lea.sflag (!%p4167_p0), [#allocation4], %s3432_s23  ;;  %s3438_s7 = scalar_lea.vmem (!%p4167_p0), [#allocation3], %s2349_s11 }
  0x51   : > { %3203 = dma.done.wait (%p4168_p5), %s224_s12, 1024  }
  0x52   : > { %3205 = vsyncadd (%p4168_p5), %s224_s12, 4294966272  ;;  %p4169_p11 = scmp.eq.s32.totalorder %s3308_s22, 0 }
  0x54   : > { %3207 = dma.done.wait (%p4169_p11), [#allocation7], 7168   ;;  %p4170_p2 = pmov %p4169_p11 }
  0x55   : > { %v4158_v0 = vmov 0.0   ;;  %v260_v1 = vld [vmem:[%s3438_s7 + $0x8] sm:$0xff]  ;;  %v262_v3 = vld [vmem:[%s3438_s7 + $0x18] sm:$0xff]  ;;  %v259_v6 = vld [vmem:[%s3438_s7] sm:$0xff]  ;;  %vm268_vm0 = vcmask 130048   ;;  %v3236_v19 = vmov 0   ;;  %v732_v62 = vlaneseq }
  0x56   : > { %3209 = vsyncadd (%p4170_p2), [#allocation7], 4294960128  ;;  %336 = vmatprep.mubr.f32.mxu0 %v4158_v0  ;;  %407 = vmatprep.mubr.f32.mxu1 %v4158_v0  ;;  %v264_v2 = vld [vmem:[%s3438_s7 + $0x28] sm:$0xff]  ;;  %v266_v5 = vld [vmem:[%s3438_s7 + $0x38] sm:$0xff]  ;;  %v3235_v14 = vmov 1.0|1.0  }
  0x57   : > { %v2801_v4 = vpack.c.bf16 %v264_v2, %v260_v1  ;;  %v263_v7 = vld [vmem:[%s3438_s7 + $0x20] sm:$0xff]  ;;  %v2805_v8 = vpack.c.bf16 %v266_v5, %v262_v3  ;;  %v261_v10 = vld [vmem:[%s3438_s7 + $0x10] sm:$0xff]  ;;  %3082 = vset.pattern.permute.xlu0 %v3236_v19  ;;  %3083 = vset.pattern.permute.xlu1 %v3236_v19  ;;  %s3237_s16 = smov 72   ;;  %s3238_s17 = smov 65   ;;  %v3599_v2 = vand.u32 127, %v732_v62  ;;  %vm802_vm4 = vcmask 1043456  }
  0x58   : > { %v2803_v9 = vpack.c.bf16 %v263_v7, %v259_v6  ;;  %v265_v11 = vld [vmem:[%s3438_s7 + $0x30] sm:$0xff]  ;;  %v267_v13 = vld [vmem:[%s4150_s1] sm:$0xf]  ;;  %s3239_s14 = smov 73   ;;  %s3240_s6 = smov 71  }
  0x59   : > { %2802 = vmatprep.subr.bf16.mxu0 %v2801_v4  ;;  %v2807_v12 = vpack.c.bf16 %v265_v11, %v261_v10  ;;  %2806 = vmatprep.subr.bf16.mxu1 %v2805_v8  ;;  %s3241_s15 = smov 63   ;;  %s3242_s13 = smov 56   ;;  %vm747_vm1 = vcmp.lt.s32.totalorder %v3599_v2, 72  ;;  %vm773_vm2 = vcmp.lt.s32.totalorder %v3599_v2, 65  ;;  %vm734_vm3 = vcmp.lt.s32.totalorder %v3599_v2, 73 }
  0x5a   : > { %2804 = vmatpush1.bf16.msra.mxu0 %v2803_v9  ;;  %s3243_s29 = smov 64   ;;  %s3244_s28 = smov 57   ;;  %vm760_vm5 = vcmp.lt.s32.totalorder %v3599_v2, 71  ;;  %vm856_vm6 = vcmp.lt.s32.totalorder %v3599_v2, 63  ;;  %vm843_vm7 = vcmp.lt.s32.totalorder %v3599_v2, 64  ;;  %vm882_vm8 = vcmp.lt.s32.totalorder %v3599_v2, 56 }
  0x5b   : > { %2808 = vmatpush1.bf16.msra.mxu1 %v2807_v12  ;;  %2809 = vmatprep.subr.bf16.mxu0 %v3235_v14  ;;  %s3245_s27 = smov 9   ;;  %s3246_s10 = smov 7   ;;  %vm869_vm9 = vcmp.lt.s32.totalorder %v3599_v2, 57  ;;  %vm964_vm10 = vcmp.lt.s32.totalorder %v3599_v2, 9  ;;  %vm990_vm11 = vcmp.lt.s32.totalorder %v3599_v2, 7  ;;  %vm951_vm12 = vcmp.lt.s32.totalorder %v3599_v2, 55 }
  0x5c   : > { %2825 = vmatprep.subr.bf16.mxu1 %v3235_v14  ;;  %s3247_s12 = smov 55   ;;  %s3248_s24 = smov 8   ;;  %vm977_vm13 = vcmp.lt.s32.totalorder %v3599_v2, 8  ;;  %vm1085_vm14 = vcmp.lt.s32.totalorder %v3599_v2, 121  ;;  %vm1059_vm15 = vcmp.lt.s32.totalorder %v3599_v2, 1 }
  0x5d   : > { %2352 = vmatmul.mubr.msk.f32.vlgmr.msra.gmra.mrb[0].mxu0 %vm268_vm0, %v267_v13  ;;  %s3249_s26 = smov 121  }
  0x5e   : > { %2353 = vmatmul.mubr.msk.f32.vlgmr.msra.gmra.mrb[0].mxu1 %vm268_vm0, %v267_v13  ;;  %2810 = vmatpush3.bf16.msra.mxu0 %v3235_v14  ;;  %vm1072_vm0 = vcmp.lt.s32.totalorder %v3599_v2, 127 }
  0x5f   : > { %2826 = vmatpush3.bf16.msra.mxu1 %v3235_v14  ;;  %2811 = vmatprep.subr.bf16.mxu0 %v3235_v14 }
  0x60   : > { %2827 = vmatprep.subr.bf16.mxu1 %v3235_v14 }
  0x62   : > { %2812 = vmatpush3.bf16.msra.mxu0 %v3235_v14 }
  0x63   : > { %2828 = vmatpush3.bf16.msra.mxu1 %v3235_v14  ;;  %2813 = vmatprep.subr.bf16.mxu0 %v3235_v14 }
  0x64   : > { %2829 = vmatprep.subr.bf16.mxu1 %v3235_v14 }
  0x66   : > { %2814 = vmatpush3.bf16.msra.mxu0 %v3235_v14 }
  0x67   : > { %2830 = vmatpush3.bf16.msra.mxu1 %v3235_v14  ;;  %2815 = vmatprep.subr.bf16.mxu0 %v3235_v14 }
  0x68   : > { %2831 = vmatprep.subr.bf16.mxu1 %v3235_v14 }
  0x6a   : > { %2816 = vmatpush3.bf16.msra.mxu0 %v3235_v14 }
  0x6b   : > { %2832 = vmatpush3.bf16.msra.mxu1 %v3235_v14  ;;  %2817 = vmatprep.subr.bf16.mxu0 %v3235_v14 }
  0x6c   : > { %2833 = vmatprep.subr.bf16.mxu1 %v3235_v14 }
  0x6e   : > { %2818 = vmatpush3.bf16.msra.mxu0 %v3235_v14 }
  0x6f   : > { %2834 = vmatpush3.bf16.msra.mxu1 %v3235_v14  ;;  %2819 = vmatprep.subr.bf16.mxu0 %v3235_v14 }
  0x70   : > { %2835 = vmatprep.subr.bf16.mxu1 %v3235_v14 }
  0x72   : > { %2820 = vmatpush3.bf16.msra.mxu0 %v3235_v14 }
  0x73   : > { %2836 = vmatpush3.bf16.msra.mxu1 %v3235_v14  ;;  %2821 = vmatprep.subr.bf16.mxu0 %v3235_v14 }
  0x74   : > { %2837 = vmatprep.subr.bf16.mxu1 %v3235_v14 }
  0x76   : > { %2822 = vmatpush3.bf16.msra.mxu0 %v3235_v14 }
  0x77   : > { %2838 = vmatpush3.bf16.msra.mxu1 %v3235_v14  ;;  %2823 = vmatprep.subr.bf16.mxu0 %v3235_v14 }
  0x78   : > { %2839 = vmatprep.subr.bf16.mxu1 %v3235_v14 }
  0x7a   : > { %2824 = vmatpush3.bf16.msra.mxu0 %v3235_v14 }
  0x7b   : > { %2840 = vmatpush3.bf16.msra.mxu1 %v3235_v14  ;;  %2841 = vmatprep.subr.bf16.mxu0 %v3235_v14 }
  0x7c   : > { %2857 = vmatprep.subr.bf16.mxu1 %v3235_v14 }
 0x130   : > { %v338_v15 = vpop.f32.mrb[0].mxu0 }
 0x131   : > { %v409_v16 = vpop.f32.mrb[0].mxu1  ;;  %v340_v17 = vpop.f32.mrb[1].mxu0 }
 0x132   : > { %v411_v18 = vpop.f32.mrb[1].mxu1  ;;  %478 = vmatprep.mubr.f32.mxu0 %v340_v17 }
 0x133   : > { %548 = vmatprep.mubr.f32.mxu1 %v411_v18  ;;  %479 = vmatmul.mubr.f32.vlgmr.msra.gmra.mrb[2].mxu0 %v338_v15 }
 0x134   : > { %549 = vmatmul.mubr.f32.vlgmr.msra.gmra.mrb[2].mxu1 %v409_v16  ;;  %2842 = vmatpush3.bf16.msra.mxu0 %v3235_v14 }
 0x135   : > { %2858 = vmatpush3.bf16.msra.mxu1 %v3235_v14  ;;  %2843 = vmatprep.subr.bf16.mxu0 %v3235_v14 }
 0x136   : > { %2859 = vmatprep.subr.bf16.mxu1 %v3235_v14 }
 0x138   : > { %2844 = vmatpush3.bf16.msra.mxu0 %v3235_v14 }
 0x139   : > { %2860 = vmatpush3.bf16.msra.mxu1 %v3235_v14  ;;  %2845 = vmatprep.subr.bf16.mxu0 %v3235_v14 }
 0x13a   : > { %2861 = vmatprep.subr.bf16.mxu1 %v3235_v14 }
 0x13c   : > { %2846 = vmatpush3.bf16.msra.mxu0 %v3235_v14 }
 0x13d   : > { %2862 = vmatpush3.bf16.msra.mxu1 %v3235_v14  ;;  %2847 = vmatprep.subr.bf16.mxu0 %v3235_v14 }
 0x13e   : > { %2863 = vmatprep.subr.bf16.mxu1 %v3235_v14 }
 0x140   : > { %2848 = vmatpush3.bf16.msra.mxu0 %v3235_v14 }
 0x141   : > { %2864 = vmatpush3.bf16.msra.mxu1 %v3235_v14  ;;  %2849 = vmatprep.subr.bf16.mxu0 %v3235_v14 }
 0x142   : > { %2865 = vmatprep.subr.bf16.mxu1 %v3235_v14 }
 0x144   : > { %2850 = vmatpush3.bf16.msra.mxu0 %v3235_v14 }
 0x145   : > { %2866 = vmatpush3.bf16.msra.mxu1 %v3235_v14  ;;  %2851 = vmatprep.subr.bf16.mxu0 %v3235_v14 }
 0x146   : > { %2867 = vmatprep.subr.bf16.mxu1 %v3235_v14 }
 0x148   : > { %2852 = vmatpush3.bf16.msra.mxu0 %v3235_v14 }
 0x149   : > { %2868 = vmatpush3.bf16.msra.mxu1 %v3235_v14  ;;  %2853 = vmatprep.subr.bf16.mxu0 %v3235_v14 }
 0x14a   : > { %2869 = vmatprep.subr.bf16.mxu1 %v3235_v14 }
 0x14c   : > { %2854 = vmatpush3.bf16.msra.mxu0 %v3235_v14 }
 0x14d   : > { %2870 = vmatpush3.bf16.msra.mxu1 %v3235_v14  ;;  %2855 = vmatprep.subr.bf16.mxu0 %v3235_v14 }
 0x14e   : > { %2871 = vmatprep.subr.bf16.mxu1 %v3235_v14 }
 0x150   : > { %2856 = vmatpush3.bf16.msra.mxu0 %v3235_v14 }
 0x151   : > { %2872 = vmatpush3.bf16.msra.mxu1 %v3235_v14 }
 0x206   : > { %v2401_v20 = vpop.f32.mrb[2].mxu0 }
 0x207   : > { %v2436_v21 = vpop.f32.mrb[2].mxu1  ;;  %v2402_v22 = vpop.f32.mrb[3].mxu0 }
 0x208   : > { %v2403_v23 = vadd.f32 %v2402_v22, %v2401_v20  ;;  %v2437_v24 = vpop.f32.mrb[3].mxu1  ;;  %v812_v22 = vld [vmem:[#allocation6 + $0x8] sm:$0xff] }
 0x209   : > { %v2438_v25 = vadd.f32 %v2437_v24, %v2436_v21 }
 0x20b   : > { %v551_v26 = vadd.f32 %v2438_v25, %v2403_v23  ;;  %v816_v25 = vld [vmem:[#allocation6 + $0x28] sm:$0xff] }
 0x20d   : > { %v554_v27 = vmul.f32 0.001953125, %v551_v26 }
 0x20f   : > { %557 = vperm.xlu0 %3082, %v554_v27  }
 0x28e   : > { %v558_v28 = vpop.permute.xlu0 %557 }
 0x28f   : > { %v560_v29 = vsub.f32 %v338_v15, %v558_v28  ;;  %v561_v30 = vsub.f32 %v340_v17, %v558_v28  ;;  %v562_v31 = vsub.f32 %v409_v16, %v558_v28  ;;  %v563_v32 = vsub.f32 %v411_v18, %v558_v28 }
 0x291   : > { %v565_v33 = vmul.f32 %v561_v30, %v561_v30  ;;  %v567_v34 = vmul.f32 %v563_v32, %v563_v32  ;;  %v564_v35 = vmul.f32 %v560_v29, %v560_v29  ;;  %v566_v36 = vmul.f32 %v562_v31, %v562_v31 }
 0x293   : > { %632 = vmatprep.mubr.f32.mxu0 %v565_v33  ;;  %702 = vmatprep.mubr.f32.mxu1 %v567_v34 }
 0x294   : > { %633 = vmatmul.mubr.f32.vlgmr.msra.gmra.mrb[4].mxu0 %v564_v35  ;;  %703 = vmatmul.mubr.f32.vlgmr.msra.gmra.mrb[4].mxu1 %v566_v36 }
 0x295   : > { %1333 = vmatprep.mubr.bf16.mxu0 %v3236_v19  ;;  %1374 = vmatprep.mubr.bf16.mxu1 %v3236_v19 }
 0x367   : > { %v2471_v37 = vpop.f32.mrb[4].mxu0  ;;  %v2506_v38 = vpop.f32.mrb[4].mxu1 }
 0x368   : > { %v2472_v39 = vpop.f32.mrb[5].mxu0  ;;  %v2507_v40 = vpop.f32.mrb[5].mxu1 }
 0x369   : > { %v2473_v41 = vadd.f32 %v2472_v39, %v2471_v37  ;;  %v2508_v42 = vadd.f32 %v2507_v40, %v2506_v38  ;;  %v811_v37 = vld [vmem:[#allocation6] sm:$0xff]  ;;  %v817_v38 = vld [vmem:[#allocation6 + $0x30] sm:$0xff] }
 0x36b   : > { %v705_v43 = vadd.f32 %v2508_v42, %v2473_v41 }
 0x36d   : > { %v708_v44 = vmul.f32 0.001953125, %v705_v43  ;;  %v814_v43 = vld [vmem:[#allocation6 + $0x18] sm:$0xff] }
 0x36f   : > { %v709_v45 = vadd.f32 1e-05, %v708_v44 }
 0x371   : > { %3084 = vrsqrt.f32 %v709_v45 }
 0x37b   : > { %v3085_v46 = vpop.eup %3084 }
 0x37c   : > { %713 = vperm.xlu0 %3082, %v3085_v46  }
 0x3fb   : > { %v714_v47 = vpop.permute.xlu0 %713 }
 0x3fc   : > { %v716_v48 = vmul.f32 %v714_v47, %v560_v29  ;;  %v718_v49 = vmul.f32 %v714_v47, %v562_v31  ;;  %v717_v50 = vmul.f32 %v714_v47, %v561_v30  ;;  %v719_v53 = vmul.f32 %v714_v47, %v563_v32  ;;  %v815_v47 = vld [vmem:[#allocation6 + $0x20] sm:$0xff] }
 0x3fe   : > { %v3525_v51 = vmax.f32 %v716_v48, 0.0  ;;  %v3527_v52 = vmax.f32 %v718_v49, 0.0  ;;  %v3531_v54 = vmax.f32 %v717_v50, 0.0  ;;  %v3535_v55 = vmax.f32 %v719_v53, 0.0  ;;  %v818_v48 = vld [vmem:[#allocation6 + $0x38] sm:$0xff]  ;;  %v813_v50 = vld [vmem:[#allocation6 + $0x10] sm:$0xff] }
 0x400   : > { %743 = vrot.lane.b32.xlu0 %v3527_v52, %s3237_s16  ;;  %739 = vrot.lane.b32.xlu1 %v3525_v51, %s3237_s16 }
 0x404   : > { %765 = vrot.lane.b32.xlu0 %v3525_v51, %s3238_s17  ;;  %741 = vrot.lane.b32.xlu1 %v3531_v54, %s3237_s16 }
 0x408   : > { %769 = vrot.lane.b32.xlu0 %v3527_v52, %s3238_s17  ;;  %745 = vrot.lane.b32.xlu1 %v3535_v55, %s3237_s16  ;;  %s3250_s16 = smov 1  }
 0x40c   : > { %724 = vrot.lane.b32.xlu0 %v3525_v51, %s3239_s14  ;;  %767 = vrot.lane.b32.xlu1 %v3531_v54, %s3238_s17 }
 0x410   : > { %728 = vrot.lane.b32.xlu0 %v3527_v52, %s3239_s14  ;;  %771 = vrot.lane.b32.xlu1 %v3535_v55, %s3238_s17  ;;  %s3251_s17 = smov 127  }
 0x414   : > { %752 = vrot.lane.b32.xlu0 %v3525_v51, %s3240_s6  ;;  %726 = vrot.lane.b32.xlu1 %v3531_v54, %s3239_s14 }
 0x418   : > { %756 = vrot.lane.b32.xlu0 %v3527_v52, %s3240_s6  ;;  %730 = vrot.lane.b32.xlu1 %v3535_v55, %s3239_s14  ;;  %s3252_s14 = smov 119  }
 0x41c   : > { %848 = vrot.lane.b32.xlu0 %v3525_v51, %s3241_s15  ;;  %754 = vrot.lane.b32.xlu1 %v3531_v54, %s3240_s6 }
 0x420   : > { %852 = vrot.lane.b32.xlu0 %v3527_v52, %s3241_s15  ;;  %758 = vrot.lane.b32.xlu1 %v3535_v55, %s3240_s6  ;;  %s3253_s6 = smov 120  }
 0x424   : > { %874 = vrot.lane.b32.xlu0 %v3525_v51, %s3242_s13  ;;  %850 = vrot.lane.b32.xlu1 %v3531_v54, %s3241_s15 }
 0x428   : > { %878 = vrot.lane.b32.xlu0 %v3527_v52, %s3242_s13  ;;  %854 = vrot.lane.b32.xlu1 %v3535_v55, %s3241_s15 }
 0x42c   : > { %835 = vrot.lane.b32.xlu0 %v3525_v51, %s3243_s29  ;;  %876 = vrot.lane.b32.xlu1 %v3531_v54, %s3242_s13 }
 0x430   : > { %839 = vrot.lane.b32.xlu0 %v3527_v52, %s3243_s29  ;;  %880 = vrot.lane.b32.xlu1 %v3535_v55, %s3242_s13 }
 0x434   : > { %861 = vrot.lane.b32.xlu0 %v3525_v51, %s3244_s28  ;;  %837 = vrot.lane.b32.xlu1 %v3531_v54, %s3243_s29 }
 0x438   : > { %865 = vrot.lane.b32.xlu0 %v3527_v52, %s3244_s28  ;;  %841 = vrot.lane.b32.xlu1 %v3535_v55, %s3243_s29 }
 0x43c   : > { %956 = vrot.lane.b32.xlu0 %v3525_v51, %s3245_s27  ;;  %863 = vrot.lane.b32.xlu1 %v3531_v54, %s3244_s28 }
 0x440   : > { %960 = vrot.lane.b32.xlu0 %v3527_v52, %s3245_s27  ;;  %867 = vrot.lane.b32.xlu1 %v3535_v55, %s3244_s28 }
 0x444   : > { %982 = vrot.lane.b32.xlu0 %v3525_v51, %s3246_s10  ;;  %958 = vrot.lane.b32.xlu1 %v3531_v54, %s3245_s27 }
 0x448   : > { %986 = vrot.lane.b32.xlu0 %v3527_v52, %s3246_s10  ;;  %962 = vrot.lane.b32.xlu1 %v3535_v55, %s3245_s27 }
 0x44c   : > { %943 = vrot.lane.b32.xlu0 %v3525_v51, %s3247_s12  ;;  %984 = vrot.lane.b32.xlu1 %v3531_v54, %s3246_s10 }
 0x450   : > { %947 = vrot.lane.b32.xlu0 %v3527_v52, %s3247_s12  ;;  %988 = vrot.lane.b32.xlu1 %v3535_v55, %s3246_s10 }
 0x454   : > { %969 = vrot.lane.b32.xlu0 %v3525_v51, %s3248_s24  ;;  %945 = vrot.lane.b32.xlu1 %v3531_v54, %s3247_s12 }
 0x458   : > { %973 = vrot.lane.b32.xlu0 %v3527_v52, %s3248_s24  ;;  %949 = vrot.lane.b32.xlu1 %v3535_v55, %s3247_s12  ;;  %s2368_s12 = sshll.u32 %s3308_s22, 10 }
 0x459   : > { %s4103_s22 = scalar_lea.hbm %s4154_s5, %s2368_s12 }
 0x45c   : > { %1077 = vrot.lane.b32.xlu0 %v3525_v51, %s3249_s26  ;;  %971 = vrot.lane.b32.xlu1 %v3531_v54, %s3248_s24 }
 0x460   : > { %1081 = vrot.lane.b32.xlu0 %v3527_v52, %s3249_s26  ;;  %975 = vrot.lane.b32.xlu1 %v3535_v55, %s3248_s24  ;;  %s257_s24 = scalar_lea.vmem [#allocation8], %s2349_s11  ;;  %s2245_s11 = scalar_lea.sflag [#allocation5], %s3432_s23 }
 0x464   : > { %1051 = vrot.lane.b32.xlu0 %v3525_v51, %s3250_s16  ;;  %1079 = vrot.lane.b32.xlu1 %v3531_v54, %s3249_s26 }
 0x468   : > { %1055 = vrot.lane.b32.xlu0 %v3527_v52, %s3250_s16  ;;  %1083 = vrot.lane.b32.xlu1 %v3535_v55, %s3249_s26  ;;  %s2258_s26 = sshll.u32 %s257_s24, 4  ;;  %s4105_s26 = int_to_ptr.vmem [resolvable:$true] %s2258_s26 }
 0x46c   : > { %1064 = vrot.lane.b32.xlu0 %v3525_v51, %s3251_s17  ;;  %1053 = vrot.lane.b32.xlu1 %v3531_v54, %s3250_s16 }
 0x470   : > { %1068 = vrot.lane.b32.xlu0 %v3527_v52, %s3251_s17  ;;  %1057 = vrot.lane.b32.xlu1 %v3535_v55, %s3250_s16 }
 0x472   : > { %v744_v56 = vpop.permute.xlu0 %743  ;;  %v740_v57 = vpop.permute.xlu1 %739 }
 0x474   : > { %1159 = vrot.lane.b32.xlu0 %v3525_v51, %s3252_s14  ;;  %1066 = vrot.lane.b32.xlu1 %v3531_v54, %s3251_s17 }
 0x476   : > { %v766_v58 = vpop.permute.xlu0 %765  ;;  %v742_v59 = vpop.permute.xlu1 %741 }
 0x477   : > { %v750_v7 = vsel %vm747_vm1, %v740_v57, %v742_v59  ;;  %v749_v15 = vsel %vm747_vm1, %v742_v59, %v744_v56 }
 0x478   : > { %1163 = vrot.lane.b32.xlu0 %v3527_v52, %s3252_s14  ;;  %1070 = vrot.lane.b32.xlu1 %v3535_v55, %s3251_s17  ;;  %v783_v13 = vrot.slane %v750_v7, 4  ;;  %v784_v35 = vrot.slane %v749_v15, 4 }
 0x47a   : > { %v770_v60 = vpop.permute.xlu0 %769  ;;  %v746_v61 = vpop.permute.xlu1 %745 }
 0x47b   : > { %v748_v16 = vsel %vm747_vm1, %v744_v56, %v746_v61  ;;  %v751_v17 = vsel %vm747_vm1, %v746_v61, %v740_v57  ;;  %vm1167_vm1 = vcmp.lt.s32.totalorder %v3599_v2, 119 }
 0x47c   : > { %1146 = vrot.lane.b32.xlu0 %v3525_v51, %s3253_s6  ;;  %1161 = vrot.lane.b32.xlu1 %v3531_v54, %s3252_s14  ;;  %v782_v31 = vrot.slane %v751_v17, 4  ;;  %v785_v32 = vrot.slane %v748_v16, 4 }
 0x47e   : > { %v725_v63 = vpop.permute.xlu0 %724  ;;  %v768_v1 = vpop.permute.xlu1 %767 }
 0x47f   : > { %v776_v8 = vsel %vm773_vm2, %v766_v58, %v768_v1  ;;  %v775_v11 = vsel %vm773_vm2, %v768_v1, %v770_v60 }
 0x480   : > { %1150 = vrot.lane.b32.xlu0 %v3527_v52, %s3253_s6  ;;  %1165 = vrot.lane.b32.xlu1 %v3535_v55, %s3252_s14  ;;  %v795_v18 = vrot.slane %v776_v8, 4  ;;  %v796_v19 = vrot.slane %v775_v11, 4  ;;  %s3254_s14 = smov [#allocation8]  }
 0x482   : > { %v729_v3 = vpop.permute.xlu0 %728  ;;  %v772_v4 = vpop.permute.xlu1 %771 }
 0x483   : > { %v774_v20 = vsel %vm773_vm2, %v770_v60, %v772_v4  ;;  %v777_v21 = vsel %vm773_vm2, %v772_v4, %v766_v58  ;;  %vm1154_vm2 = vcmp.lt.s32.totalorder %v3599_v2, 120 }
 0x484   : > { %1148 = vrot.lane.b32.xlu1 %v3531_v54, %s3253_s6  ;;  %v794_v41 = vrot.slane %v777_v21, 4  ;;  %v797_v42 = vrot.slane %v774_v20, 4  ;;  %v1213_v20 = vld [vmem:[#allocation6 + $0x148] sm:$0xff] }
 0x486   : > { %v753_v5 = vpop.permute.xlu0 %752  ;;  %v727_v6 = vpop.permute.xlu1 %726 }
 0x487   : > { %v737_v12 = vsel %vm734_vm3, %v725_v63, %v727_v6  ;;  %v736_v33 = vsel %vm734_vm3, %v727_v6, %v729_v3 }
 0x488   : > { %1152 = vrot.lane.b32.xlu1 %v3535_v55, %s3253_s6  ;;  %v3626_v23 = vsel %vm802_vm4, %v737_v12, %v783_v13  ;;  %v3653_v53 = vsel %vm802_vm4, %v736_v33, %v784_v35  ;;  %s3162_s6 = sshll.u32 %s3254_s14, 4  ;;  %s3163_s6 = int_to_ptr.vmem [resolvable:$false] %s3162_s6 }
 0x489   : > { %v820_v36 = vmul.f32 %v812_v22, %v3626_v23  ;;  %v821_v4 = vmul.f32 %v813_v50, %v3653_v53  ;;  %s3164_s15 = scalar_lea.vmem %s3163_s6, 2048  ;;  %p3165_p10 = scmp.lt.s32.totalorder %s4105_s26, %s3163_s6 }
 0x48a   : > { %v757_v9 = vpop.permute.xlu0 %756  ;;  %v731_v10 = vpop.permute.xlu1 %730 }
 0x48b   : > { %v735_v27 = vsel %vm734_vm3, %v729_v3, %v731_v10  ;;  %v738_v28 = vsel %vm734_vm3, %v731_v10, %v725_v63  ;;  %vm1695_vm3 = vcmask 31744  }
 0x48c   : > { %v3647_v44 = vsel %vm802_vm4, %v738_v28, %v782_v31  ;;  %v3650_v45 = vsel %vm802_vm4, %v735_v27, %v785_v32  ;;  %v1217_v27 = vld [vmem:[#allocation6 + $0x168] sm:$0xff] }
 0x48d   : > { %v819_v62 = vmul.f32 %v811_v37, %v3647_v44  ;;  %v822_v63 = vmul.f32 %v814_v43, %v3650_v45 }
 0x48e   : > { %v3628_v24 = vpop.permute.xlu0 %848  ;;  %v755_v26 = vpop.permute.xlu1 %754 }
 0x48f   : > { %v762_v29 = vsel %vm760_vm5, %v755_v26, %v757_v9  ;;  %v763_v30 = vsel %vm760_vm5, %v753_v5, %v755_v26  ;;  %v1216_v26 = vld [vmem:[#allocation6 + $0x160] sm:$0xff] }
 0x490   : > { %v3641_v34 = vsel %vm802_vm4, %v763_v30, %v795_v18  ;;  %v809_v39 = vsel %vm802_vm4, %v762_v29, %v796_v19  ;;  %v1212_v19 = vld [vmem:[#allocation6 + $0x140] sm:$0xff] }
 0x491   : > { %v824_v40 = vmul.f32 %v816_v25, %v3641_v34  ;;  %v825_v59 = vmul.f32 %v817_v38, %v809_v39  ;;  %v3693_v37 = vmul.f32 %v1213_v20, %v809_v39  ;;  %v1214_v38 = vld [vmem:[#allocation6 + $0x150] sm:$0xff] }
 0x492   : > { %v853_v46 = vpop.permute.xlu0 %852  ;;  %v759_v49 = vpop.permute.xlu1 %758 }
 0x493   : > { %v761_v56 = vsel %vm760_vm5, %v757_v9, %v759_v49  ;;  %v764_v57 = vsel %vm760_vm5, %v759_v49, %v753_v5  ;;  %v828_v58 = vpack.c.bf16 %v824_v40, %v820_v36  ;;  %v829_v9 = vpack.c.bf16 %v825_v59, %v821_v4  ;;  %v1219_v49 = vld [vmem:[#allocation6 + $0x178] sm:$0xff] }
 0x494   : > { %v3660_v60 = vsel %vm802_vm4, %v764_v57, %v794_v41  ;;  %v810_v61 = vsel %vm802_vm4, %v761_v56, %v797_v42  ;;  %v3691_v36 = vmul.f32 %v1212_v19, %v3641_v34  ;;  %v1215_v41 = vld [vmem:[#allocation6 + $0x158] sm:$0xff]  ;;  %v1218_v34 = vld [vmem:[#allocation6 + $0x170] sm:$0xff] }
 0x495   : > { %v823_v1 = vmul.f32 %v815_v47, %v3660_v60  ;;  %v826_v3 = vmul.f32 %v818_v48, %v810_v61  ;;  %1301 = vmatprep.subr.bf16.mxu0 %v828_v58  ;;  %v925_v19 = vld [vmem:[#allocation6 + $0x70] sm:$0xff] }
 0x496   : > { %v875_v6 = vpop.permute.xlu0 %874  ;;  %v851_v7 = vpop.permute.xlu1 %850 }
 0x497   : > { %v827_v5 = vpack.c.bf16 %v823_v1, %v819_v62  ;;  %v830_v8 = vpack.c.bf16 %v826_v3, %v822_v63  ;;  %v858_v17 = vsel %vm856_vm6, %v851_v7, %v853_v46  ;;  %v859_v18 = vsel %vm856_vm6, %v3628_v24, %v851_v7 }
 0x498   : > { %v892_v21 = vrot.slane %v859_v18, 4  ;;  %v893_v22 = vrot.slane %v858_v17, 4  ;;  %v3715_v63 = vmul.f32 %v1214_v38, %v810_v61  ;;  %v3718_v1 = vmul.f32 %v1215_v41, %v3660_v60  ;;  %v924_v61 = vld [vmem:[#allocation6 + $0x68] sm:$0xff]  ;;  %v919_v18 = vld [vmem:[#allocation6 + $0x40] sm:$0xff] }
 0x499   : > { %1302 = vmatpush1.bf16.msra.mxu0 %v827_v5  ;;  %1342 = vmatprep.subr.bf16.mxu1 %v830_v8 }
 0x49a   : > { %v879_v10 = vpop.permute.xlu0 %878  ;;  %1343 = vmatpush1.bf16.msra.mxu1 %v829_v9  ;;  %v855_v11 = vpop.permute.xlu1 %854 }
 0x49b   : > { %v857_v29 = vsel %vm856_vm6, %v853_v46, %v855_v11  ;;  %v860_v30 = vsel %vm856_vm6, %v855_v11, %v3628_v24  ;;  %v920_v11 = vld [vmem:[#allocation6 + $0x48] sm:$0xff] }
 0x49c   : > { %v891_v42 = vrot.slane %v860_v30, 4  ;;  %v894_v43 = vrot.slane %v857_v29, 4  ;;  %v923_v29 = vld [vmem:[#allocation6 + $0x60] sm:$0xff]  ;;  %v926_v30 = vld [vmem:[#allocation6 + $0x78] sm:$0xff] }
 0x49e   : > { %v836_v12 = vpop.permute.xlu0 %835  ;;  %v877_v13 = vpop.permute.xlu1 %876 }
 0x49f   : > { %v884_v46 = vsel %vm882_vm8, %v877_v13, %v879_v10  ;;  %v885_v47 = vsel %vm882_vm8, %v875_v6, %v877_v13 }
 0x4a0   : > { %v904_v7 = vrot.slane %v885_v47, 4  ;;  %v905_v5 = vrot.slane %v884_v46, 4 }
 0x4a2   : > { %v840_v15 = vpop.permute.xlu0 %839  ;;  %v881_v16 = vpop.permute.xlu1 %880 }
 0x4a3   : > { %v883_v8 = vsel %vm882_vm8, %v879_v10, %v881_v16  ;;  %v886_v9 = vsel %vm882_vm8, %v881_v16, %v875_v6 }
 0x4a6   : > { %v3675_v25 = vpop.permute.xlu0 %861  ;;  %v838_v28 = vpop.permute.xlu1 %837 }
 0x4a7   : > { %v845_v31 = vsel %vm843_vm7, %v838_v28, %v840_v15  ;;  %v846_v32 = vsel %vm843_vm7, %v836_v12, %v838_v28 }
 0x4a8   : > { %v912_v33 = vsel %vm802_vm4, %v846_v32, %v892_v21  ;;  %v3688_v35 = vsel %vm802_vm4, %v845_v31, %v893_v22  ;;  %v903_v22 = vrot.slane %v886_v9, 4  ;;  %v921_v32 = vld [vmem:[#allocation6 + $0x50] sm:$0xff] }
 0x4a9   : > { %v3695_v40 = vmul.f32 %v1216_v26, %v912_v33  ;;  %v3698_v24 = vmul.f32 %v1217_v27, %v3688_v35  ;;  %v928_v16 = vmul.f32 %v920_v11, %v912_v33  ;;  %v906_v26 = vrot.slane %v883_v8, 4  ;;  %v922_v27 = vld [vmem:[#allocation6 + $0x58] sm:$0xff] }
 0x4aa   : > { %v866_v48 = vpop.permute.xlu0 %865  ;;  %v842_v39 = vpop.permute.xlu1 %841 }
 0x4ab   : > { %v1228_v50 = vpack.c.bf16 %v3695_v40, %v3691_v36  ;;  %v844_v56 = vsel %vm843_vm7, %v840_v15, %v842_v39  ;;  %v847_v57 = vsel %vm843_vm7, %v842_v39, %v836_v12  ;;  %v1229_v58 = vpack.c.bf16 %v3698_v24, %v3693_v37  ;;  %v1242_v37 = vld [vmem:[#allocation6 + $0x190] sm:$0xff]  ;;  %v1268_v36 = vld [vmem:[%s4151_s2] sm:$0x3] }
 0x4ac   : > { %v911_v59 = vsel %vm802_vm4, %v847_v57, %v891_v42  ;;  %v914_v62 = vsel %vm802_vm4, %v844_v56, %v894_v43 }
 0x4ad   : > { %v3720_v3 = vmul.f32 %v1218_v34, %v914_v62  ;;  %v3722_v4 = vmul.f32 %v1219_v49, %v911_v59  ;;  %v927_v47 = vmul.f32 %v919_v18, %v911_v59  ;;  %v930_v34 = vmul.f32 %v922_v27, %v914_v62 }
 0x4ae   : > { %v3728_v12 = vpop.permute.xlu0 %956  ;;  %v864_v13 = vpop.permute.xlu1 %863 }
 0x4af   : > { %v1230_v60 = vpack.c.bf16 %v3720_v3, %v3715_v63  ;;  %v871_v15 = vsel %vm869_vm9, %v864_v13, %v866_v48  ;;  %v872_v17 = vsel %vm869_vm9, %v3675_v25, %v864_v13  ;;  %v1231_v10 = vpack.c.bf16 %v3722_v4, %v3718_v1 }
 0x4b0   : > { %v3740_v6 = vsel %vm802_vm4, %v872_v17, %v904_v7  ;;  %v3743_v20 = vsel %vm802_vm4, %v871_v15, %v905_v5 }
 0x4b1   : > { %v932_v21 = vmul.f32 %v924_v61, %v3740_v6  ;;  %v933_v42 = vmul.f32 %v925_v19, %v3743_v20 }
 0x4b2   : > { %v961_v28 = vpop.permute.xlu0 %960  ;;  %v868_v31 = vpop.permute.xlu1 %867 }
 0x4b3   : > { %v870_v38 = vsel %vm869_vm9, %v866_v48, %v868_v31  ;;  %v873_v33 = vsel %vm869_vm9, %v868_v31, %v3675_v25  ;;  %v936_v41 = vpack.c.bf16 %v932_v21, %v928_v16  ;;  %v929_v48 = vmul.f32 %v921_v32, %v3688_v35 }
 0x4b4   : > { %v3753_v43 = vsel %vm802_vm4, %v873_v33, %v903_v22  ;;  %v3756_v46 = vsel %vm802_vm4, %v870_v38, %v906_v26  ;;  %v1028_v33 = vld [vmem:[#allocation6 + $0x88] sm:$0xff] }
 0x4b5   : > { %v931_v49 = vmul.f32 %v923_v29, %v3753_v43  ;;  %v934_v39 = vmul.f32 %v926_v30, %v3756_v46  ;;  %1303 = vmatprep.subr.bf16.mxu0 %v936_v41  ;;  %v937_v5 = vpack.c.bf16 %v933_v42, %v929_v48 }
 0x4b6   : > { %v983_v56 = vpop.permute.xlu0 %982  ;;  %v959_v25 = vpop.permute.xlu1 %958 }
 0x4b7   : > { %v935_v57 = vpack.c.bf16 %v931_v49, %v927_v47  ;;  %v938_v7 = vpack.c.bf16 %v934_v39, %v930_v34  ;;  %v967_v35 = vsel %vm964_vm10, %v3728_v12, %v959_v25  ;;  %v966_v26 = vsel %vm964_vm10, %v959_v25, %v961_v28  ;;  %v1032_v47 = vld [vmem:[#allocation6 + $0xa8] sm:$0xff] }
 0x4b8   : > { %v1000_v22 = vrot.slane %v967_v35, 4 }
 0x4b9   : > { %1304 = vmatpush1.bf16.msra.mxu0 %v935_v57  ;;  %1344 = vmatprep.subr.bf16.mxu1 %v938_v7  ;;  %v1001_v7 = vrot.slane %v966_v26, 4  ;;  %v1029_v26 = vld [vmem:[#allocation6 + $0x90] sm:$0xff] }
 0x4ba   : > { %v987_v8 = vpop.permute.xlu0 %986  ;;  %1345 = vmatpush1.bf16.msra.mxu1 %v937_v5  ;;  %v963_v9 = vpop.permute.xlu1 %962 }
 0x4bb   : > { %v965_v27 = vsel %vm964_vm10, %v961_v28, %v963_v9  ;;  %v968_v29 = vsel %vm964_vm10, %v963_v9, %v3728_v12  ;;  %v1033_v9 = vld [vmem:[#allocation6 + $0xb0] sm:$0xff] }
 0x4bc   : > { %v999_v48 = vrot.slane %v968_v29, 4 }
 0x4be   : > { %v944_v11 = vpop.permute.xlu0 %943  ;;  %v985_v59 = vpop.permute.xlu1 %984 }
 0x4bf   : > { %v993_v17 = vsel %vm990_vm11, %v983_v56, %v985_v59  ;;  %v992_v19 = vsel %vm990_vm11, %v985_v59, %v987_v8 }
 0x4c0   : > { %v1012_v30 = vrot.slane %v993_v17, 4  ;;  %v1013_v31 = vrot.slane %v992_v19, 4  ;;  %v1030_v17 = vld [vmem:[#allocation6 + $0x98] sm:$0xff] }
 0x4c2   : > { %v948_v62 = vpop.permute.xlu0 %947  ;;  %v989_v61 = vpop.permute.xlu1 %988 }
 0x4c3   : > { %v991_v32 = vsel %vm990_vm11, %v987_v8, %v989_v61  ;;  %v994_v38 = vsel %vm990_vm11, %v989_v61, %v983_v56  ;;  %v1002_v56 = vrot.slane %v965_v27, 4  ;;  %v1027_v8 = vld [vmem:[#allocation6 + $0x80] sm:$0xff] }
 0x4c4   : > { %v1011_v61 = vrot.slane %v994_v38, 4  ;;  %v1014_v35 = vrot.slane %v991_v32, 4 }
 0x4c6   : > { %v970_v13 = vpop.permute.xlu0 %969  ;;  %v946_v15 = vpop.permute.xlu1 %945 }
 0x4c7   : > { %v3771_v21 = vsel %vm951_vm12, %v944_v11, %v946_v15  ;;  %v3797_v25 = vsel %vm951_vm12, %v946_v15, %v948_v62  ;;  %v1031_v15 = vld [vmem:[#allocation6 + $0xa0] sm:$0xff] }
 0x4c8   : > { %v1020_v41 = vsel %vm802_vm4, %v3771_v21, %v1000_v22  ;;  %v1034_v22 = vld [vmem:[#allocation6 + $0xb8] sm:$0xff]  ;;  %v1021_v29 = vsel %vm802_vm4, %v3797_v25, %v1001_v7 }
 0x4c9   : > { %v1036_v5 = vmul.f32 %v1028_v33, %v1020_v41 }
 0x4ca   : > { %v974_v16 = vpop.permute.xlu0 %973  ;;  %v950_v18 = vpop.permute.xlu1 %949 }
 0x4cb   : > { %v3785_v28 = vsel %vm951_vm12, %v948_v62, %v950_v18  ;;  %v3789_v12 = vsel %vm951_vm12, %v950_v18, %v944_v11 }
 0x4cc   : > { %v1019_v18 = vsel %vm802_vm4, %v3789_v12, %v999_v48  ;;  %v1022_v19 = vsel %vm802_vm4, %v3785_v28, %v1002_v56  ;;  %v1037_v48 = vmul.f32 %v1029_v26, %v1021_v29 }
 0x4ce   : > { %v3781_v42 = vpop.permute.xlu0 %1077  ;;  %v972_v34 = vpop.permute.xlu1 %971 }
 0x4cf   : > { %v979_v49 = vsel %vm977_vm13, %v972_v34, %v974_v16  ;;  %v980_v39 = vsel %vm977_vm13, %v970_v13, %v972_v34  ;;  %v1038_v34 = vmul.f32 %v1030_v17, %v1022_v19  ;;  %v1094_v19 = vrot.slane %v3525_v51, 4 }
 0x4d0   : > { %v1024_v57 = vsel %vm802_vm4, %v980_v39, %v1012_v30  ;;  %v1025_v11 = vsel %vm802_vm4, %v979_v49, %v1013_v31 }
 0x4d1   : > { %v1040_v59 = vmul.f32 %v1032_v47, %v1024_v57  ;;  %v1041_v38 = vmul.f32 %v1033_v9, %v1025_v11  ;;  %v1035_v47 = vmul.f32 %v1027_v8, %v1019_v18  ;;  %v1095_v18 = vrot.slane %v3531_v54, 4 }
 0x4d2   : > { %v1082_v62 = vpop.permute.xlu0 %1081  ;;  %v976_v27 = vpop.permute.xlu1 %975 }
 0x4d3   : > { %v978_v30 = vsel %vm977_vm13, %v974_v16, %v976_v27  ;;  %v981_v31 = vsel %vm977_vm13, %v976_v27, %v970_v13  ;;  %v1044_v32 = vpack.c.bf16 %v1040_v59, %v1036_v5  ;;  %v1045_v16 = vpack.c.bf16 %v1041_v38, %v1037_v48  ;;  %v1123_v27 = vld [vmem:[#allocation6 + $0xc8] sm:$0xff] }
 0x4d4   : > { %v1023_v33 = vsel %vm802_vm4, %v981_v31, %v1011_v61  ;;  %v1026_v41 = vsel %vm802_vm4, %v978_v30, %v1014_v35  ;;  %v1122_v31 = vld [vmem:[#allocation6 + $0xc0] sm:$0xff]  ;;  %v1097_v48 = vrot.slane %v3535_v55, 4 }
 0x4d5   : > { %v1039_v49 = vmul.f32 %v1031_v15, %v1023_v33  ;;  %v1042_v39 = vmul.f32 %v1034_v22, %v1026_v41  ;;  %1305 = vmatprep.subr.bf16.mxu0 %v1044_v32  ;;  %v1126_v33 = vld [vmem:[#allocation6 + $0xe0] sm:$0xff]  ;;  %v1127_v41 = vld [vmem:[#allocation6 + $0xe8] sm:$0xff] }
 0x4d6   : > { %v1052_v56 = vpop.permute.xlu0 %1051  ;;  %v1080_v57 = vpop.permute.xlu1 %1079 }
 0x4d7   : > { %v1043_v7 = vpack.c.bf16 %v1039_v49, %v1035_v47  ;;  %v1046_v0 = vpack.c.bf16 %v1042_v39, %v1038_v34  ;;  %v1087_v8 = vsel %vm1085_vm14, %v1080_v57, %v1082_v62  ;;  %v1088_v59 = vsel %vm1085_vm14, %v3781_v42, %v1080_v57 }
 0x4d8   : > { %v1106_v15 = vrot.slane %v1088_v59, 4  ;;  %v1107_v22 = vrot.slane %v1087_v8, 4  ;;  %v1096_v39 = vrot.slane %v3527_v52, 4 }
 0x4d9   : > { %1306 = vmatpush1.bf16.msra.mxu0 %v1043_v7  ;;  %1346 = vmatprep.subr.bf16.mxu1 %v1046_v0  ;;  %v1124_v7 = vld [vmem:[#allocation6 + $0xd0] sm:$0xff] }
 0x4da   : > { %v1056_v13 = vpop.permute.xlu0 %1055  ;;  %1347 = vmatpush1.bf16.msra.mxu1 %v1045_v16  ;;  %v1084_v5 = vpop.permute.xlu1 %1083  ;;  %v1238_v55 = vsel %vm802_vm4, %v3785_v28, %v1096_v39  ;;  %v1250_v28 = vmul.f32 %v1242_v37, %v3756_v46 }
 0x4db   : > { %v1086_v26 = vsel %vm1085_vm14, %v1082_v62, %v1084_v5  ;;  %v1089_v29 = vsel %vm1085_vm14, %v1084_v5, %v3781_v42 }
 0x4dc   : > { %v1109_v59 = vrot.slane %v1089_v29, 4 }
 0x4de   : > { %v1065_v9 = vpop.permute.xlu0 %1064  ;;  %v1054_v11 = vpop.permute.xlu1 %1053 }
 0x4df   : > { %v1062_v17 = vsel %vm1059_vm15, %v1052_v56, %v1054_v11  ;;  %v1061_v34 = vsel %vm1059_vm15, %v1054_v11, %v1056_v13 }
 0x4e0   : > { %v1115_v30 = vsel %vm802_vm4, %v1062_v17, %v1095_v18  ;;  %v1125_v17 = vld [vmem:[#allocation6 + $0xd8] sm:$0xff] }
 0x4e1   : > { %v1131_v16 = vmul.f32 %v1123_v27, %v1115_v30 }
 0x4e2   : > { %v1069_v61 = vpop.permute.xlu0 %1068  ;;  %v1058_v35 = vpop.permute.xlu1 %1057 }
 0x4e3   : > { %v1063_v0 = vsel %vm1059_vm15, %v1058_v35, %v1052_v56  ;;  %v1060_v62 = vsel %vm1059_vm15, %v1056_v13, %v1058_v35  ;;  %v1108_v13 = vrot.slane %v1086_v26, 4  ;;  %v1116_v35 = vsel %vm802_vm4, %v1061_v34, %v1096_v39 }
 0x4e4   : > { %v1114_v32 = vsel %vm802_vm4, %v1063_v0, %v1094_v19  ;;  %v1117_v0 = vsel %vm802_vm4, %v1060_v62, %v1097_v48 }
 0x4e5   : > { %v1130_v5 = vmul.f32 %v1122_v31, %v1114_v32  ;;  %v1132_v32 = vmul.f32 %v1124_v7, %v1116_v35  ;;  %v1188_v35 = vld [vmem:[#allocation6 + $0x100] sm:$0xff] }
 0x4e6   : > { %v1160_v38 = vpop.permute.xlu0 %1159  ;;  %v1067_v47 = vpop.permute.xlu1 %1066 }
 0x4e7   : > { %v1074_v42 = vsel %vm1072_vm0, %v1067_v47, %v1069_v61  ;;  %v1075_v49 = vsel %vm1072_vm0, %v1065_v9, %v1067_v47 }
 0x4e8   : > { %v1118_v56 = vsel %vm802_vm4, %v1075_v49, %v1106_v15  ;;  %v1119_v57 = vsel %vm802_vm4, %v1074_v42, %v1107_v22  ;;  %v1128_v15 = vld [vmem:[#allocation6 + $0xf0] sm:$0xff]  ;;  %v1129_v49 = vld [vmem:[#allocation6 + $0xf8] sm:$0xff] }
 0x4e9   : > { %v1134_v11 = vmul.f32 %v1126_v33, %v1118_v56  ;;  %v1135_v8 = vmul.f32 %v1127_v41, %v1119_v57  ;;  %v1133_v33 = vmul.f32 %v1125_v17, %v1117_v0  ;;  %v1189_v17 = vld [vmem:[#allocation6 + $0x108] sm:$0xff] }
 0x4ea   : > { %v1164_v47 = vpop.permute.xlu0 %1163  ;;  %v1071_v22 = vpop.permute.xlu1 %1070 }
 0x4eb   : > { %v1138_v42 = vpack.c.bf16 %v1134_v11, %v1130_v5  ;;  %v1073_v27 = vsel %vm1072_vm0, %v1069_v61, %v1071_v22  ;;  %v1076_v26 = vsel %vm1072_vm0, %v1071_v22, %v1065_v9  ;;  %v1139_v29 = vpack.c.bf16 %v1135_v8, %v1131_v16  ;;  %v1192_v16 = vld [vmem:[#allocation6 + $0x120] sm:$0xff]  ;;  %v1193_v11 = vld [vmem:[#allocation6 + $0x128] sm:$0xff] }
 0x4ec   : > { %v1120_v30 = vsel %vm802_vm4, %v1073_v27, %v1108_v13  ;;  %v1121_v31 = vsel %vm802_vm4, %v1076_v26, %v1109_v59 }
 0x4ed   : > { %v1136_v41 = vmul.f32 %v1128_v15, %v1120_v30  ;;  %v1137_v34 = vmul.f32 %v1129_v49, %v1121_v31  ;;  %1307 = vmatprep.subr.bf16.mxu0 %v1139_v29  ;;  %v1200_v29 = vmul.f32 %v1192_v16, %v3626_v23  ;;  %v1201_v30 = vmul.f32 %v1193_v11, %v3653_v53  ;;  %v1194_v31 = vld [vmem:[#allocation6 + $0x130] sm:$0xff]  ;;  %v1241_v11 = vld [vmem:[#allocation6 + $0x188] sm:$0xff] }
 0x4ee   : > { %v1162_v62 = vpop.permute.xlu1 %1161  ;;  %1308 = vmatpush1.bf16.msra.mxu0 %v1138_v42  ;;  %v1147_v5 = vpop.permute.xlu0 %1146  ;;  %v1202_v16 = vmul.f32 %v1194_v31, %v3650_v45  ;;  %v1240_v45 = vld [vmem:[#allocation6 + $0x180] sm:$0xff] }
 0x4ef   : > { %v1140_v56 = vpack.c.bf16 %v1136_v41, %v1132_v32  ;;  %v1141_v57 = vpack.c.bf16 %v1137_v34, %v1133_v33  ;;  %v1169_v61 = vsel %vm1167_vm1, %v1162_v62, %v1164_v47  ;;  %v1170_v7 = vsel %vm1167_vm1, %v1160_v38, %v1162_v62  ;;  %v1195_v32 = vld [vmem:[#allocation6 + $0x138] sm:$0xff]  ;;  %v1245_v41 = vld [vmem:[#allocation6 + $0x1a8] sm:$0xff] }
 0x4f0   : > { %v1176_v8 = vrot.slane %v1170_v7, 4  ;;  %v1177_v13 = vrot.slane %v1169_v61, 4  ;;  %v1203_v54 = vmul.f32 %v1195_v32, %v3647_v44  ;;  %v1239_v44 = vsel %vm802_vm4, %v3789_v12, %v1097_v48 }
 0x4f1   : > { %1348 = vmatprep.subr.bf16.mxu1 %v1141_v57  ;;  %v1191_v57 = vld [vmem:[#allocation6 + $0x118] sm:$0xff]  ;;  %v1248_v48 = vmul.f32 %v1240_v45, %v3740_v6 }
 0x4f2   : > { %1349 = vmatpush1.bf16.msra.mxu1 %v1140_v56  ;;  %v1166_v9 = vpop.permute.xlu1 %1165  ;;  %v1151_v59 = vpop.permute.xlu0 %1150  ;;  %v1190_v56 = vld [vmem:[#allocation6 + $0x110] sm:$0xff] }
 0x4f3   : > { %v1168_v15 = vsel %vm1167_vm1, %v1164_v47, %v1166_v9  ;;  %v1171_v49 = vsel %vm1167_vm1, %v1166_v9, %v1160_v38  ;;  %v1237_v38 = vsel %vm802_vm4, %v3797_v25, %v1095_v18 }
 0x4f4   : > { %v1178_v34 = vrot.slane %v1168_v15, 4  ;;  %v1179_v62 = vrot.slane %v1171_v49, 4  ;;  %v1246_v15 = vld [vmem:[#allocation6 + $0x1b0] sm:$0xff] }
 0x4f6   : > { %v1149_v0 = vpop.permute.xlu1 %1148 }
 0x4f7   : > { %v1156_v22 = vsel %vm1154_vm2, %v1149_v0, %v1151_v59  ;;  %v1157_v42 = vsel %vm1154_vm2, %v1147_v5, %v1149_v0 }
 0x4f8   : > { %v1184_v27 = vsel %vm802_vm4, %v1157_v42, %v1176_v8  ;;  %v1185_v26 = vsel %vm802_vm4, %v1156_v22, %v1177_v13  ;;  %v1244_v8 = vld [vmem:[#allocation6 + $0x1a0] sm:$0xff]  ;;  %v1236_v13 = vsel %vm802_vm4, %v3771_v21, %v1094_v19  ;;  %v1243_v21 = vld [vmem:[#allocation6 + $0x198] sm:$0xff] }
 0x4f9   : > { %v1196_v47 = vmul.f32 %v1188_v35, %v1184_v27  ;;  %v1197_v33 = vmul.f32 %v1189_v17, %v1185_v26  ;;  %v1249_v17 = vmul.f32 %v1241_v11, %v3743_v20  ;;  %v1252_v19 = vmul.f32 %v1244_v8, %v1236_v13 }
 0x4fa   : > { %v1153_v9 = vpop.permute.xlu1 %1152  ;;  %v1251_v24 = vmul.f32 %v1243_v21, %v3753_v43 }
 0x4fb   : > { %v1204_v61 = vpack.c.bf16 %v1200_v29, %v1196_v47  ;;  %v1155_v23 = vsel %vm1154_vm2, %v1151_v59, %v1153_v9  ;;  %v1158_v53 = vsel %vm1154_vm2, %v1153_v9, %v1147_v5  ;;  %v1205_v7 = vpack.c.bf16 %v1201_v30, %v1197_v33  ;;  %v1247_v5 = vld [vmem:[#allocation6 + $0x1b8] sm:$0xff] }
 0x4fc   : > { %v1186_v25 = vsel %vm802_vm4, %v1155_v23, %v1178_v34  ;;  %v1187_v18 = vsel %vm802_vm4, %v1158_v53, %v1179_v62  ;;  %v1253_v59 = vmul.f32 %v1245_v41, %v1237_v38  ;;  %v1255_v49 = vmul.f32 %v1247_v5, %v1239_v44 }
 0x4fd   : > { %v1198_v35 = vmul.f32 %v1190_v56, %v1186_v25  ;;  %v1199_v2 = vmul.f32 %v1191_v57, %v1187_v18  ;;  %1309 = vmatprep.subr.bf16.mxu0 %v1205_v7  ;;  %v1256_v52 = vpack.c.bf16 %v1252_v19, %v1248_v48  ;;  %v4171_v56 = vmov 0.0  }
 0x4fe   : > { %1310 = vmatpush1.bf16.msra.mxu0 %v1204_v61  ;;  %v1257_v12 = vpack.c.bf16 %v1253_v59, %v1249_v17  ;;  %v1259_v20 = vpack.c.bf16 %v1255_v49, %v1251_v24  ;;  %v1693_v17 = vld [vmem:[%s4152_s3] sm:$0xff] }
 0x4ff   : > { %v1206_v0 = vpack.c.bf16 %v1202_v16, %v1198_v35  ;;  %1311 = vmatprep.subr.bf16.mxu0 %v1229_v58  ;;  %v1207_v51 = vpack.c.bf16 %v1203_v54, %v1199_v2  ;;  %v1254_v58 = vmul.f32 %v1246_v15, %v1238_v55 }
 0x501   : > { %1350 = vmatprep.subr.bf16.mxu1 %v1207_v51  ;;  %v1258_v40 = vpack.c.bf16 %v1254_v58, %v1250_v28 }
 0x502   : > { %1312 = vmatpush1.bf16.msra.mxu0 %v1228_v50  ;;  %1351 = vmatpush1.bf16.msra.mxu1 %v1206_v0  ;;  %v1694_v0 = vld [vmem:[%s4152_s3 + $0x8] sm:$0xff] }
 0x503   : > { %1313 = vmatprep.subr.bf16.mxu0 %v1257_v12  ;;  %1352 = vmatprep.subr.bf16.mxu1 %v1231_v10 }
 0x506   : > { %1314 = vmatpush1.bf16.msra.mxu0 %v1256_v52  ;;  %1353 = vmatpush1.bf16.msra.mxu1 %v1230_v60 }
 0x507   : > { %1354 = vmatprep.subr.bf16.mxu1 %v1259_v20  ;;  %2873 = vmatprep.subr.bf16.mxu0 %v3235_v14 }
 0x509   : > { %1334 = vmatmul.mubr.bf16.vlgmr.msra.gmra.mrb[8].mxu0 %v1268_v36 }
 0x50a   : > { %1355 = vmatpush1.bf16.msra.mxu1 %v1258_v40  ;;  %2874 = vmatpush3.bf16.msra.mxu0 %v3235_v14 }
 0x50b   : > { %2889 = vmatprep.subr.bf16.mxu1 %v3235_v14  ;;  %2875 = vmatprep.subr.bf16.mxu0 %v3235_v14 }
 0x50d   : > { %1375 = vmatmul.mubr.bf16.vlgmr.msra.gmra.mrb[8].mxu1 %v1268_v36 }
 0x50e   : > { %2890 = vmatpush3.bf16.msra.mxu1 %v3235_v14  ;;  %2876 = vmatpush3.bf16.msra.mxu0 %v3235_v14 }
 0x50f   : > { %2891 = vmatprep.subr.bf16.mxu1 %v3235_v14  ;;  %2877 = vmatprep.subr.bf16.mxu0 %v3235_v14 }
 0x512   : > { %2892 = vmatpush3.bf16.msra.mxu1 %v3235_v14  ;;  %2878 = vmatpush3.bf16.msra.mxu0 %v3235_v14 }
 0x513   : > { %2893 = vmatprep.subr.bf16.mxu1 %v3235_v14  ;;  %2879 = vmatprep.subr.bf16.mxu0 %v3235_v14 }
 0x516   : > { %2894 = vmatpush3.bf16.msra.mxu1 %v3235_v14  ;;  %2880 = vmatpush3.bf16.msra.mxu0 %v3235_v14 }
 0x517   : > { %2895 = vmatprep.subr.bf16.mxu1 %v3235_v14  ;;  %2881 = vmatprep.subr.bf16.mxu0 %v3235_v14 }
 0x51a   : > { %2896 = vmatpush3.bf16.msra.mxu1 %v3235_v14  ;;  %2882 = vmatpush3.bf16.msra.mxu0 %v3235_v14 }
 0x51b   : > { %2897 = vmatprep.subr.bf16.mxu1 %v3235_v14  ;;  %2883 = vmatprep.subr.bf16.mxu0 %v3235_v14 }
 0x51e   : > { %2898 = vmatpush3.bf16.msra.mxu1 %v3235_v14  ;;  %2884 = vmatpush3.bf16.msra.mxu0 %v3235_v14 }
 0x51f   : > { %2899 = vmatprep.subr.bf16.mxu1 %v3235_v14  ;;  %2885 = vmatprep.subr.bf16.mxu0 %v3235_v14 }
 0x522   : > { %2900 = vmatpush3.bf16.msra.mxu1 %v3235_v14  ;;  %2886 = vmatpush3.bf16.msra.mxu0 %v3235_v14 }
 0x523   : > { %2901 = vmatprep.subr.bf16.mxu1 %v3235_v14  ;;  %2887 = vmatprep.subr.bf16.mxu0 %v3235_v14 }
 0x526   : > { %2902 = vmatpush3.bf16.msra.mxu1 %v3235_v14  ;;  %2888 = vmatpush3.bf16.msra.mxu0 %v3235_v14 }
 0x527   : > { %2903 = vmatprep.subr.bf16.mxu1 %v3235_v14  ;;  %2905 = vmatprep.subr.bf16.mxu0 %v3235_v14 }
 0x52a   : > { %2904 = vmatpush3.bf16.msra.mxu1 %v3235_v14 }
 0x52b   : > { %2921 = vmatprep.subr.bf16.mxu1 %v3235_v14 }
 0x5dc   : > { %v1335_v50 = vpop.f32.mrb[8].mxu0 }
 0x5dd   : > { %v1337_v63 = vpop.f32.mrb[9].mxu0 }
 0x5de   : > { %v1339_v1 = vpop.f32.mrb[10].mxu0  ;;  %1447 = vmatprep.mubr.f32.mxu0 %v1337_v63 }
 0x5df   : > { %v1340_v3 = vpop.f32.mrb[11].mxu0  ;;  %1448 = vmatmul.mubr.f32.vlgmr.msra.gmra.mrb[6].mxu0 %v1335_v50 }
 0x5e0   : > { %v1376_v4 = vpop.f32.mrb[8].mxu1  ;;  %2906 = vmatpush3.bf16.msra.mxu0 %v3235_v14 }
 0x5e1   : > { %v1378_v60 = vpop.f32.mrb[9].mxu1  ;;  %2907 = vmatprep.subr.bf16.mxu0 %v3235_v14 }
 0x5e2   : > { %v1380_v10 = vpop.f32.mrb[10].mxu1  ;;  %1517 = vmatprep.mubr.f32.mxu1 %v1378_v60 }
 0x5e3   : > { %v1381_v6 = vpop.f32.mrb[11].mxu1  ;;  %1518 = vmatmul.mubr.f32.vlgmr.msra.gmra.mrb[6].mxu1 %v1376_v4 }
 0x5e4   : > { %2922 = vmatpush3.bf16.msra.mxu1 %v3235_v14  ;;  %2908 = vmatpush3.bf16.msra.mxu0 %v3235_v14 }
 0x5e5   : > { %2923 = vmatprep.subr.bf16.mxu1 %v3235_v14  ;;  %2909 = vmatprep.subr.bf16.mxu0 %v3235_v14 }
 0x5e8   : > { %2924 = vmatpush3.bf16.msra.mxu1 %v3235_v14  ;;  %2910 = vmatpush3.bf16.msra.mxu0 %v3235_v14 }
 0x5e9   : > { %2925 = vmatprep.subr.bf16.mxu1 %v3235_v14  ;;  %2911 = vmatprep.subr.bf16.mxu0 %v3235_v14 }
 0x5ec   : > { %2926 = vmatpush3.bf16.msra.mxu1 %v3235_v14  ;;  %2912 = vmatpush3.bf16.msra.mxu0 %v3235_v14 }
 0x5ed   : > { %2927 = vmatprep.subr.bf16.mxu1 %v3235_v14  ;;  %2913 = vmatprep.subr.bf16.mxu0 %v3235_v14 }
 0x5f0   : > { %2928 = vmatpush3.bf16.msra.mxu1 %v3235_v14  ;;  %2914 = vmatpush3.bf16.msra.mxu0 %v3235_v14 }
 0x5f1   : > { %2929 = vmatprep.subr.bf16.mxu1 %v3235_v14  ;;  %2915 = vmatprep.subr.bf16.mxu0 %v3235_v14 }
 0x5f4   : > { %2930 = vmatpush3.bf16.msra.mxu1 %v3235_v14  ;;  %2916 = vmatpush3.bf16.msra.mxu0 %v3235_v14 }
 0x5f5   : > { %2931 = vmatprep.subr.bf16.mxu1 %v3235_v14  ;;  %2917 = vmatprep.subr.bf16.mxu0 %v3235_v14 }
 0x5f8   : > { %2932 = vmatpush3.bf16.msra.mxu1 %v3235_v14  ;;  %2918 = vmatpush3.bf16.msra.mxu0 %v3235_v14 }
 0x5f9   : > { %2933 = vmatprep.subr.bf16.mxu1 %v3235_v14  ;;  %2919 = vmatprep.subr.bf16.mxu0 %v3235_v14 }
 0x5fc   : > { %2934 = vmatpush3.bf16.msra.mxu1 %v3235_v14  ;;  %2920 = vmatpush3.bf16.msra.mxu0 %v3235_v14 }
 0x5fd   : > { %2935 = vmatprep.subr.bf16.mxu1 %v3235_v14 }
 0x600   : > { %2936 = vmatpush3.bf16.msra.mxu1 %v3235_v14 }
 0x6b2   : > { %v2541_v43 = vpop.f32.mrb[6].mxu0 }
 0x6b3   : > { %v2542_v46 = vpop.f32.mrb[7].mxu0 }
 0x6b4   : > { %v2543_v39 = vadd.f32 %v2542_v46, %v2541_v43 }
 0x6b6   : > { %v2576_v22 = vpop.f32.mrb[6].mxu1 }
 0x6b7   : > { %v2577_v42 = vpop.f32.mrb[7].mxu1 }
 0x6b8   : > { %v2578_v27 = vadd.f32 %v2577_v42, %v2576_v22 }
 0x6ba   : > { %v1520_v26 = vadd.f32 %v2578_v27, %v2543_v39 }
 0x6bc   : > { %v1523_v29 = vmul.f32 0.001953125, %v1520_v26 }
 0x6be   : > { %1526 = vperm.xlu0 %3082, %v1523_v29  }
 0x73d   : > { %v1527_v30 = vpop.permute.xlu0 %1526 }
 0x73e   : > { %v1529_v31 = vsub.f32 %v1335_v50, %v1527_v30  ;;  %v1530_v32 = vsub.f32 %v1337_v63, %v1527_v30  ;;  %v1531_v47 = vsub.f32 %v1376_v4, %v1527_v30  ;;  %v1532_v33 = vsub.f32 %v1378_v60, %v1527_v30 }
 0x740   : > { %v1534_v41 = vmul.f32 %v1530_v32, %v1530_v32  ;;  %v1536_v38 = vmul.f32 %v1532_v33, %v1532_v33  ;;  %v1533_v34 = vmul.f32 %v1529_v31, %v1529_v31  ;;  %v1535_v62 = vmul.f32 %v1531_v47, %v1531_v47 }
 0x742   : > { %1601 = vmatprep.mubr.f32.mxu0 %v1534_v41  ;;  %1671 = vmatprep.mubr.f32.mxu1 %v1536_v38 }
 0x743   : > { %1602 = vmatmul.mubr.f32.vlgmr.msra.gmra.mrb[12].mxu0 %v1533_v34  ;;  %1672 = vmatmul.mubr.f32.vlgmr.msra.gmra.mrb[12].mxu1 %v1535_v62 }
 0x744   : > { %1778 = vmatprep.mubr.f32.mxu0 %v4171_v56  ;;  %1855 = vmatprep.mubr.f32.mxu1 %v4171_v56 }
 0x816   : > { %v2611_v57 = vpop.f32.mrb[12].mxu0  ;;  %v2646_v9 = vpop.f32.mrb[12].mxu1 }
 0x817   : > { %v2612_v61 = vpop.f32.mrb[13].mxu0  ;;  %v2647_v23 = vpop.f32.mrb[13].mxu1 }
 0x818   : > { %v2613_v53 = vadd.f32 %v2612_v61, %v2611_v57  ;;  %v2648_v7 = vadd.f32 %v2647_v23, %v2646_v9 }
 0x81a   : > { %v1674_v16 = vadd.f32 %v2648_v7, %v2613_v53 }
 0x81c   : > { %v1677_v54 = vmul.f32 0.001953125, %v1674_v16 }
 0x81e   : > { %v1678_v11 = vadd.f32 1e-05, %v1677_v54 }
 0x820   : > { %3086 = vrsqrt.f32 %v1678_v11 }
 0x82a   : > { %v3087_v25 = vpop.eup %3086 }
 0x82b   : > { %1682 = vperm.xlu1 %3083, %v3087_v25  }
 0x8aa   : > { %v1683_v18 = vpop.permute.xlu1 %1682 }
 0x8ab   : > { %v1685_v8 = vmul.f32 %v1683_v18, %v1529_v31  ;;  %v1686_v13 = vmul.f32 %v1683_v18, %v1530_v32  ;;  %v1687_v59 = vmul.f32 %v1683_v18, %v1531_v47  ;;  %v1688_v35 = vmul.f32 %v1683_v18, %v1532_v33 }
 0x8ad   : > { %v1689_v2 = vmax.f32 %v1685_v8, 0.0  ;;  %v1690_v5 = vmax.f32 %v1686_v13, 0.0  ;;  %v1691_v44 = vmax.f32 %v1687_v59, 0.0  ;;  %v1692_v45 = vmax.f32 %v1688_v35, 0.0 }
 0x8af   : > { %2354 = vmatprep.subr.msk.mxu0 %vm802_vm4, %v1690_v5  ;;  %2358 = vmatprep.subr.msk.mxu1 %vm802_vm4, %v1692_v45 }
 0x8b0   : > { %2355 = vmatpush1.msk.msra.mxu0 %vm802_vm4, %v1689_v2  ;;  %2359 = vmatpush1.msk.msra.mxu1 %vm802_vm4, %v1691_v44 }
 0x8b1   : > { %2356 = vmatmul.mubr.msk.f32.vlgmr.msra.gmra.mrb[14].mxu0 %vm1695_vm3, %v1693_v17  ;;  %2360 = vmatmul.mubr.msk.f32.vlgmr.msra.gmra.mrb[14].mxu1 %vm1695_vm3, %v1693_v17 }
 0x8b2   : > { %1784 = vmatprep.mubr.f32.mxu0 %v4171_v56  ;;  %1861 = vmatprep.mubr.f32.mxu1 %v4171_v56 }
 0x8b3   : > { %2937 = vmatprep.subr.bf16.mxu0 %v3235_v14  ;;  %2953 = vmatprep.subr.bf16.mxu1 %v3235_v14 }
 0x8b4   : > { %2938 = vmatpush3.bf16.msra.mxu0 %v3235_v14  ;;  %2954 = vmatpush3.bf16.msra.mxu1 %v3235_v14 }
 0x8b5   : > { %2357 = vmatmul.mubr.msk.f32.gmra.mrb[16].mxu0 %vm1695_vm3, %v1694_v0  ;;  %2361 = vmatmul.mubr.msk.f32.gmra.mrb[16].mxu1 %vm1695_vm3, %v1694_v0 }
 0x8b6   : > { %2939 = vmatprep.subr.bf16.mxu0 %v3235_v14  ;;  %2955 = vmatprep.subr.bf16.mxu1 %v3235_v14 }
 0x8b8   : > { %2940 = vmatpush3.bf16.msra.mxu0 %v3235_v14  ;;  %2956 = vmatpush3.bf16.msra.mxu1 %v3235_v14 }
 0x8b9   : > { %2941 = vmatprep.subr.bf16.mxu0 %v3235_v14  ;;  %2957 = vmatprep.subr.bf16.mxu1 %v3235_v14 }
 0x8bc   : > { %2942 = vmatpush3.bf16.msra.mxu0 %v3235_v14  ;;  %2958 = vmatpush3.bf16.msra.mxu1 %v3235_v14 }
 0x8bd   : > { %2943 = vmatprep.subr.bf16.mxu0 %v3235_v14  ;;  %2959 = vmatprep.subr.bf16.mxu1 %v3235_v14 }
 0x8c0   : > { %2944 = vmatpush3.bf16.msra.mxu0 %v3235_v14  ;;  %2960 = vmatpush3.bf16.msra.mxu1 %v3235_v14 }
 0x8c1   : > { %2945 = vmatprep.subr.bf16.mxu0 %v3235_v14  ;;  %2961 = vmatprep.subr.bf16.mxu1 %v3235_v14 }
 0x8c4   : > { %2946 = vmatpush3.bf16.msra.mxu0 %v3235_v14  ;;  %2962 = vmatpush3.bf16.msra.mxu1 %v3235_v14 }
 0x8c5   : > { %2947 = vmatprep.subr.bf16.mxu0 %v3235_v14  ;;  %2963 = vmatprep.subr.bf16.mxu1 %v3235_v14 }
 0x8c8   : > { %2948 = vmatpush3.bf16.msra.mxu0 %v3235_v14  ;;  %2964 = vmatpush3.bf16.msra.mxu1 %v3235_v14 }
 0x8c9   : > { %2949 = vmatprep.subr.bf16.mxu0 %v3235_v14  ;;  %2965 = vmatprep.subr.bf16.mxu1 %v3235_v14 }
 0x8cc   : > { %2950 = vmatpush3.bf16.msra.mxu0 %v3235_v14  ;;  %2966 = vmatpush3.bf16.msra.mxu1 %v3235_v14 }
 0x8cd   : > { %2951 = vmatprep.subr.bf16.mxu0 %v3235_v14  ;;  %2967 = vmatprep.subr.bf16.mxu1 %v3235_v14 }
 0x8d0   : > { %2952 = vmatpush3.bf16.msra.mxu0 %v3235_v14  ;;  %2968 = vmatpush3.bf16.msra.mxu1 %v3235_v14 }
 0x8d1   : > { %2969 = vmatprep.subr.bf16.mxu0 %v3235_v14  ;;  %2985 = vmatprep.subr.bf16.mxu1 %v3235_v14 }
 0x984   : > { %v4027_v51 = vpop.f32.mrb[14].mxu0  ;;  %v4029_v21 = vpop.f32.mrb[14].mxu1 }
 0x985   : > { %v4031_v19 = vpop.f32.mrb[15].mxu0  ;;  %v4033_v15 = vpop.f32.mrb[15].mxu1 }
 0x986   : > { %1932 = vmatprep.mubr.f32.mxu0 %v4031_v19  ;;  %2007 = vmatprep.mubr.f32.mxu1 %v4033_v15 }
 0x987   : > { %1933 = vmatmul.mubr.f32.vlgmr.msra.gmra.mrb[18].mxu0 %v4027_v51  ;;  %2008 = vmatmul.mubr.f32.vlgmr.msra.gmra.mrb[18].mxu1 %v4029_v21 }
 0x988   : > { %v4039_v55 = vpop.f32.mrb[16].mxu0  ;;  %v4041_v49 = vpop.f32.mrb[16].mxu1  ;;  %2970 = vmatpush3.bf16.msra.mxu0 %v3235_v14  ;;  %2986 = vmatpush3.bf16.msra.mxu1 %v3235_v14 }
 0x989   : > { %v4045_v12 = vpop.f32.mrb[17].mxu0  ;;  %v4047_v48 = vpop.f32.mrb[17].mxu1  ;;  %2971 = vmatprep.subr.bf16.mxu0 %v3235_v14  ;;  %2987 = vmatprep.subr.bf16.mxu1 %v3235_v14 }
 0x98a   : > { %1937 = vmatprep.mubr.f32.mxu0 %v4045_v12  ;;  %2012 = vmatprep.mubr.f32.mxu1 %v4047_v48 }
 0x98b   : > { %1938 = vmatmul.mubr.f32.gmra.mrb[20].mxu0 %v4039_v55  ;;  %2013 = vmatmul.mubr.f32.gmra.mrb[20].mxu1 %v4041_v49 }
 0x98c   : > { %2972 = vmatpush3.bf16.msra.mxu0 %v3235_v14  ;;  %2988 = vmatpush3.bf16.msra.mxu1 %v3235_v14 }
 0x98d   : > { %2973 = vmatprep.subr.bf16.mxu0 %v3235_v14  ;;  %2989 = vmatprep.subr.bf16.mxu1 %v3235_v14 }
 0x990   : > { %2974 = vmatpush3.bf16.msra.mxu0 %v3235_v14  ;;  %2990 = vmatpush3.bf16.msra.mxu1 %v3235_v14 }
 0x991   : > { %2975 = vmatprep.subr.bf16.mxu0 %v3235_v14  ;;  %2991 = vmatprep.subr.bf16.mxu1 %v3235_v14 }
 0x994   : > { %2976 = vmatpush3.bf16.msra.mxu0 %v3235_v14  ;;  %2992 = vmatpush3.bf16.msra.mxu1 %v3235_v14 }
 0x995   : > { %2977 = vmatprep.subr.bf16.mxu0 %v3235_v14  ;;  %2993 = vmatprep.subr.bf16.mxu1 %v3235_v14 }
 0x998   : > { %2978 = vmatpush3.bf16.msra.mxu0 %v3235_v14  ;;  %2994 = vmatpush3.bf16.msra.mxu1 %v3235_v14 }
 0x999   : > { %2979 = vmatprep.subr.bf16.mxu0 %v3235_v14  ;;  %2995 = vmatprep.subr.bf16.mxu1 %v3235_v14 }
 0x99c   : > { %2980 = vmatpush3.bf16.msra.mxu0 %v3235_v14  ;;  %2996 = vmatpush3.bf16.msra.mxu1 %v3235_v14 }
 0x99d   : > { %2981 = vmatprep.subr.bf16.mxu0 %v3235_v14  ;;  %2997 = vmatprep.subr.bf16.mxu1 %v3235_v14 }
 0x9a0   : > { %2982 = vmatpush3.bf16.msra.mxu0 %v3235_v14  ;;  %2998 = vmatpush3.bf16.msra.mxu1 %v3235_v14 }
 0x9a1   : > { %2983 = vmatprep.subr.bf16.mxu0 %v3235_v14  ;;  %2999 = vmatprep.subr.bf16.mxu1 %v3235_v14 }
 0x9a4   : > { %2984 = vmatpush3.bf16.msra.mxu0 %v3235_v14  ;;  %3000 = vmatpush3.bf16.msra.mxu1 %v3235_v14 }
 0xa5a   : > { %v2681_v37 = vpop.f32.mrb[18].mxu0  ;;  %v2719_v24 = vpop.f32.mrb[18].mxu1 }
 0xa5b   : > { %v2682_v52 = vpop.f32.mrb[19].mxu0  ;;  %v2720_v58 = vpop.f32.mrb[19].mxu1 }
 0xa5c   : > { %v2683_v20 = vadd.f32 %v2682_v52, %v2681_v37  ;;  %v2721_v28 = vadd.f32 %v2720_v58, %v2719_v24  ;;  %v3095_v24 = vld [vmem:[%s3438_s7 + $0x18] sm:$0xff] }
 0xa5e   : > { %v2010_v36 = vadd.f32 %v2721_v28, %v2683_v20  ;;  %v2684_v40 = vpop.f32.mrb[20].mxu0  ;;  %v2722_v50 = vpop.f32.mrb[20].mxu1 }
 0xa5f   : > { %v2685_v63 = vpop.f32.mrb[21].mxu0  ;;  %v2723_v1 = vpop.f32.mrb[21].mxu1 }
 0xa60   : > { %v2018_v3 = vmul.f32 0.001953125, %v2010_v36  ;;  %v2686_v4 = vadd.f32 %v2685_v63, %v2684_v40  ;;  %v2724_v60 = vadd.f32 %v2723_v1, %v2722_v50 }
 0xa62   : > { %v2015_v10 = vadd.f32 %v2724_v60, %v2686_v4  ;;  %2022 = vperm.xlu0 %3082, %v2018_v3   ;;  %v3096_v4 = vld [vmem:[%s3438_s7 + $0x20] sm:$0xff] }
 0xa64   : > { %v2019_v6 = vmul.f32 0.001953125, %v2015_v10  ;;  %v3097_v10 = vld [vmem:[%s3438_s7 + $0x28] sm:$0xff] }
 0xa66   : > { %2027 = vperm.xlu1 %3083, %v2019_v6  }
 0xae1   : > { %v2023_v43 = vpop.permute.xlu0 %2022 }
 0xae2   : > { %v2030_v14 = vsub.f32 %v4027_v51, %v2023_v43  ;;  %v2031_v46 = vsub.f32 %v4031_v19, %v2023_v43  ;;  %v2032_v39 = vsub.f32 %v4029_v21, %v2023_v43  ;;  %v2033_v22 = vsub.f32 %v4033_v15, %v2023_v43  ;;  %v3092_v15 = vld [vmem:[%s3438_s7] sm:$0xff]  ;;  %v3098_v43 = vld [vmem:[%s3438_s7 + $0x30] sm:$0xff] }
 0xae4   : > { %v2038_v42 = vmul.f32 %v2030_v14, %v2030_v14  ;;  %v2040_v27 = vmul.f32 %v2032_v39, %v2032_v39  ;;  %v2039_v26 = vmul.f32 %v2031_v46, %v2031_v46  ;;  %v2041_v29 = vmul.f32 %v2033_v22, %v2033_v22 }
 0xae5   : > { %v2028_v30 = vpop.permute.xlu1 %2027 }
 0xae6   : > { %v2034_v31 = vsub.f32 %v4039_v55, %v2028_v30  ;;  %v2035_v32 = vsub.f32 %v4045_v12, %v2028_v30  ;;  %v2036_v47 = vsub.f32 %v4041_v49, %v2028_v30  ;;  %v2037_v33 = vsub.f32 %v4047_v48, %v2028_v30  ;;  %2110 = vmatprep.mubr.f32.mxu0 %v2039_v26  ;;  %v3093_v49 = vld [vmem:[%s3438_s7 + $0x8] sm:$0xff]  ;;  %v3094_v48 = vld [vmem:[%s3438_s7 + $0x10] sm:$0xff] }
 0xae7   : > { %2185 = vmatprep.mubr.f32.mxu1 %v2041_v29  ;;  %2111 = vmatmul.mubr.f32.vlgmr.msra.gmra.mrb[22].mxu0 %v2038_v42 }
 0xae8   : > { %2186 = vmatmul.mubr.f32.vlgmr.msra.gmra.mrb[22].mxu1 %v2040_v27  ;;  %v2043_v41 = vmul.f32 %v2035_v32, %v2035_v32  ;;  %v2045_v38 = vmul.f32 %v2037_v33, %v2037_v33  ;;  %v2042_v34 = vmul.f32 %v2034_v31, %v2034_v31  ;;  %v2044_v62 = vmul.f32 %v2036_v47, %v2036_v47 }
 0xaea   : > { %2115 = vmatprep.mubr.f32.mxu0 %v2043_v41  ;;  %2190 = vmatprep.mubr.f32.mxu1 %v2045_v38 }
 0xaeb   : > { %2116 = vmatmul.mubr.f32.gmra.mrb[24].mxu0 %v2042_v34 }
 0xaec   : > { %2191 = vmatmul.mubr.f32.gmra.mrb[24].mxu1 %v2044_v62 }
 0xbba   : > { %v2757_v56 = vpop.f32.mrb[22].mxu0 }
 0xbbb   : > { %v2795_v57 = vpop.f32.mrb[22].mxu1  ;;  %v2758_v9 = vpop.f32.mrb[23].mxu0 }
 0xbbc   : > { %v2759_v61 = vadd.f32 %v2758_v9, %v2757_v56  ;;  %v2796_v23 = vpop.f32.mrb[23].mxu1 }
 0xbbd   : > { %v2797_v53 = vadd.f32 %v2796_v23, %v2795_v57 }
 0xbbe   : > { %v2760_v7 = vpop.f32.mrb[24].mxu0 }
 0xbbf   : > { %v2188_v16 = vadd.f32 %v2797_v53, %v2759_v61  ;;  %v2798_v54 = vpop.f32.mrb[24].mxu1  ;;  %v2761_v11 = vpop.f32.mrb[25].mxu0 }
 0xbc0   : > { %v2762_v25 = vadd.f32 %v2761_v11, %v2760_v7  ;;  %v2799_v18 = vpop.f32.mrb[25].mxu1 }
 0xbc1   : > { %v2196_v8 = vmul.f32 0.001953125, %v2188_v16  ;;  %v2800_v13 = vadd.f32 %v2799_v18, %v2798_v54 }
 0xbc3   : > { %v2198_v59 = vadd.f32 1e-05, %v2196_v8  ;;  %v2193_v35 = vadd.f32 %v2800_v13, %v2762_v25 }
 0xbc5   : > { %3088 = vrsqrt.f32 %v2198_v59  ;;  %v2197_v2 = vmul.f32 0.001953125, %v2193_v35 }
 0xbc7   : > { %v2199_v5 = vadd.f32 1e-05, %v2197_v2 }
 0xbc9   : > { %3090 = vrsqrt.f32 %v2199_v5 }
 0xbcf   : > { %v3089_v44 = vpop.eup %3088 }
 0xbd0   : > { %2204 = vperm.xlu0 %3082, %v3089_v44  }
 0xbd3   : > { %v3091_v45 = vpop.eup %3090 }
 0xbd4   : > { %2209 = vperm.xlu1 %3083, %v3091_v45  }
 0xc4f   : > { %v2205_v17 = vpop.permute.xlu0 %2204 }
 0xc50   : > { %v2212_v0 = vmul.f32 %v2205_v17, %v2030_v14  ;;  %v2213_v51 = vmul.f32 %v2205_v17, %v2031_v46  ;;  %v2214_v21 = vmul.f32 %v2205_v17, %v2032_v39  ;;  %v2215_v19 = vmul.f32 %v2205_v17, %v2033_v22  ;;  %v3099_v46 = vld [vmem:[%s3438_s7 + $0x38] sm:$0xff]  ;;  %s3158_s7 = scalar_lea.vmem %s4105_s26, 1024 }
 0xc51   : > { %p3159_p4 = scmp.ne.s32.totalorder %s4105_s26, %s3158_s7  ;;  %p3166_p13 = scmp.lt.s32.totalorder %s3164_s15, %s3158_s7 }
 0xc52   : > { %v2220_v55 = vadd.f32 %v3092_v15, %v2212_v0  ;;  %v2221_v12 = vadd.f32 %v3093_v49, %v2213_v51  ;;  %v2222_v37 = vadd.f32 %v3094_v48, %v2214_v21  ;;  %v2223_v52 = vadd.f32 %v3095_v24, %v2215_v19 }
 0xc53   : > { %v2210_v58 = vpop.permute.xlu1 %2209  ;;  %p3160_p6 = pnand %p3159_p4, %p3381_p12  ;;  %p3167_p3 = por %p3166_p13, %p3165_p10 }
 0xc54   : > { %v2228_v20 = vmax.f32 %v2220_v55, 0.0  ;;  %v2229_v28 = vmax.f32 %v2221_v12, 0.0  ;;  %v2230_v36 = vmax.f32 %v2222_v37, 0.0  ;;  %v2231_v40 = vmax.f32 %v2223_v52, 0.0 }
 0xc55   : > { %v2216_v50 = vmul.f32 %v2210_v58, %v2034_v31  ;;  %v2217_v63 = vmul.f32 %v2210_v58, %v2035_v32  ;;  %v2218_v1 = vmul.f32 %v2210_v58, %v2036_v47  ;;  %v2219_v3 = vmul.f32 %v2210_v58, %v2037_v33  ;;  %p3161_p8 = pneg %p3160_p6 }
 0xc56   : > { %2236 = vst [vmem:[%s257_s24] sm:$0xff] %v2228_v20  ;;  %2237 = vst [vmem:[%s257_s24 + $0x8] sm:$0xff] %v2229_v28 }
 0xc57   : > { %2238 = vst [vmem:[%s257_s24 + $0x10] sm:$0xff] %v2230_v36  ;;  %2239 = vst [vmem:[%s257_s24 + $0x18] sm:$0xff] %v2231_v40  ;;  %v2224_v60 = vadd.f32 %v3096_v4, %v2216_v50  ;;  %v2225_v6 = vadd.f32 %v3097_v10, %v2217_v63  ;;  %v2226_v14 = vadd.f32 %v3098_v43, %v2218_v1  ;;  %p3168_p7 = pnand %p3167_p3, %p3161_p8 }
 0xc58   : > { %v2227_v39 = vadd.f32 %v3099_v46, %v2219_v3 }
 0xc59   : > { %v2232_v22 = vmax.f32 %v2224_v60, 0.0  ;;  %v2233_v42 = vmax.f32 %v2225_v6, 0.0  ;;  %v2234_v27 = vmax.f32 %v2226_v14, 0.0 }
 0xc5a   : > { %v2235_v26 = vmax.f32 %v2227_v39, 0.0 }
 0xc5b   : > { %2240 = vst [vmem:[%s257_s24 + $0x20] sm:$0xff] %v2232_v22  ;;  %2241 = vst [vmem:[%s257_s24 + $0x28] sm:$0xff] %v2233_v42 }
 0xc5c   : > { %2242 = vst [vmem:[%s257_s24 + $0x30] sm:$0xff] %v2234_v27  ;;  %2243 = vst [vmem:[%s257_s24 + $0x38] sm:$0xff] %v2235_v26 }
 0xc5d   : > { %3171 = shalt.err (!%p3168_p7)
}
 0xc5e   : > { %s3172_s13 = scalar_lea.hbm %s4103_s22, 1024  ;;  %s3176_s27 = scalar_lea.hbm %s4154_s5, 2048 }
 0xc5f   : > { %p3173_p9 = scmp.ne.s32.totalorder %s4103_s22, %s3172_s13  ;;  %p3177_p5 = scmp.lt.u32.totalorder %s4103_s22, %s4154_s5 }
 0xc60   : > { %p3178_p11 = scmp.lt.u32.totalorder %s3176_s27, %s3172_s13  ;;  %p3180_p4 = scmp.lt.u32.totalorder %s3172_s13, %s4103_s22 }
 0xc61   : > { %p3174_p1 = pnand %p3173_p9, %p3381_p12 }
 0xc62   : > { %p3179_p2 = por %p3178_p11, %p3177_p5 }
 0xc63   : > { %p3175_p0 = pneg %p3174_p1 }
 0xc64   : > { %p3181_p6 = por %p3180_p4, %p3179_p2 }
 0xc66   : > { %p3182_p8 = pnand %p3181_p6, %p3175_p0 }
 0xc68   : > { %3185 = shalt.err (!%p3182_p8)
}
 0xc69   : > { %s3255_s24 = smov 512   ;;  %s3256_s16 = smov 32  }
 0xc6a   : > { %3007 = dma.vmem_to_hbm [thread:$0]  (%p3381_p12), %s4105_s26, 1024, %s4103_s22, %s2245_s11, %s3255_s24, %s3255_s24, %s3256_s16  }
 0xc6b PF: > { %s2273_s17 = sand.u32 1, %s3216_s18   ;;  %p4172_p10 = scmp.ne.s32.totalorder %s4161_s25, 0 }
 0xc6c   : > { %p4173_p13 = scmp.ge.s32.totalorder %s3228_s21, 2  ;;  %s2274_s7 = scalar_lea.sflag [#allocation5], %s2273_s17 }
 0xc6e   : > { %p3018_p3 = pnand %p4173_p13, %p4172_p10 }
 0xc70   : > { %3211 = dma.done.wait (!%p3018_p3), %s2274_s7, 1024  }
 0xc71   : > { %3213 = vsyncadd (!%p3018_p3), %s2274_s7, 4294966272  ;;  %p19_p7 = scmp.ge.s32.totalorder %s3343_s30, 4   ;;  %s4174_s18 = smov %s3220_s19 }
 0xc72   : > { %s4175_s19 = smov %s3224_s20  ;;  %s4176_s20 = smov %s3377_s8 }
 0xc73   : > { %s4177_s21 = smov %s3343_s30  ;;  %21 = sbr.rel (!%p19_p7) target bundleno = 6 (0x6), region = 89 }
 0xc7a   :  { %2279 = vsyncpa [#allocation4], 1 }
 0xc7b   :  { %2281 = vsyncpa [#allocation4 + $0x1], 1 }
 0xc7c   :  { %2282 = vsyncpa [#allocation7], 1 }
 0xc7d   :  { %2283 = vsyncpa [#allocation5], 1 }
 0xc7e   :  { %2285 = vsyncpa [#allocation5 + $0x1], 1 }

</bundles_post_ra>
